<compile_context>
chip_gen: v6e
topology: v6e:2x2x1
jax: 0.10.0
libtpu: 0.0.40
codegen_flags: <defaults>
</compile_context>

<pallas_src>
import functools

import jax
import jax.numpy as jnp
from jax import lax
from jax.experimental import pallas as pl
from jax.experimental.pallas import tpu as pltpu

LANE = 128      # minor (lane) tile width
SUBLANE = 8     # second-minor (sublane) tile width


def _round_up(v, m):
    return ((v + m - 1) // m) * m


def _relu6(x):
    return jnp.minimum(jnp.maximum(x, 0.0), 6.0)


def _pick_row_tile(hout):
    # TODO(synk): derive the row tile from a per-generation VMEM budget
    # (v7x has only 64 MiB physical VMEM); 8-row strips are a safe default.
    for cand in (8, 16, 4, 2):
        if hout % cand == 0:
            return cand
    return hout


def _inverted_residual_kernel(*refs, ksize, pad, stride, wl, th_out, w_out,
                              top_zero, bottom_zero, use_res, has_expand,
                              compute_dtype):
    """One (batch, row-tile) grid step of the fused InvertedResidual block.

    refs (expand_ratio > 1):  x, w1, b1, wdw, b2, w2, b3, out, dw_scr, acc_scr
    refs (expand_ratio == 1): x,          wdw, b2, w2, b3, out, dw_scr, acc_scr
    """
    if has_expand:
        (x_ref, w1_ref, b1_ref, wdw_ref, b2_ref, w2_ref, b3_ref,
         o_ref, dw_ref, acc_ref) = refs
    else:
        (x_ref, wdw_ref, b2_ref, w2_ref, b3_ref,
         o_ref, dw_ref, acc_ref) = refs

    th_in, w_in, cinp = x_ref.shape[1], x_ref.shape[2], x_ref.shape[3]
    chid = dw_ref.shape[2]
    coutp = o_ref.shape[3]
    ws = dw_ref.shape[1]
    t = pl.program_id(1)
    n_row_tiles = pl.num_programs(1)

    # ---- 1x1 expand conv (MXU, compute_dtype operands, f32 accumulation)
    #      + BN bias + ReLU6.  BN scale is pre-folded into w1 by the wrapper.
    if has_expand:
        xm = x_ref[0].reshape(th_in * w_in, cinp).astype(compute_dtype)
        h = jnp.dot(xm, w1_ref[...], preferred_element_type=jnp.float32)
        h = _relu6(h + b1_ref[...]).reshape(th_in, w_in, chid)
    else:
        h = x_ref[0]        # expand_ratio == 1: depthwise runs directly on x

    # ---- stage the expanded tile into the W-padded depthwise scratch.
    #      `wl` is a multiple of 8, so the big interior store is
    #      sublane-aligned (unmasked).
    dw_ref[:, wl:wl + w_in, :] = h

    # Only the halo needs zeroing; the interior is fully rewritten every grid
    # step -> no full-scratch memset and no cross-step scratch state
    # (megacore-safe with both grid axes "parallel").
    if pad > 0:
        zcols = jnp.zeros((th_in, pad, chid), jnp.float32)
        dw_ref[:, wl - pad:wl, :] = zcols
        dw_ref[:, wl + w_in:wl + w_in + pad, :] = zcols
        if top_zero > 0:
            @pl.when(t == 0)
            def _():
                dw_ref[0:top_zero, :, :] = jnp.zeros(
                    (top_zero, ws, chid), jnp.float32)
        if bottom_zero > 0:
            @pl.when(t == n_row_tiles - 1)
            def _():
                dw_ref[th_in - bottom_zero:th_in, :, :] = jnp.zeros(
                    (bottom_zero, ws, chid), jnp.float32)

    # ---- depthwise KxK conv + BN bias + ReLU6 (VPU, f32).  Accumulate into a
    #      VMEM scratch so vreg pressure stays bounded for realistic tiles.
    wdw = wdw_ref[...]                                # (K, K, chid), scale-folded
    acc_ref[...] = jnp.broadcast_to(b2_ref[...].reshape(1, 1, chid),
                                    (th_out, w_out, chid))
    col0 = wl - pad
    for kh in range(ksize):
        for kw in range(ksize):
            if stride == 1:
                win = dw_ref[kh:kh + th_out,
                             col0 + kw:col0 + kw + w_out, :]
            else:
                win = dw_ref[pl.ds(kh, th_out, stride),
                             pl.ds(col0 + kw, w_out, stride), :]
            acc_ref[...] += win * wdw[kh, kw, :]
    h2 = _relu6(acc_ref[...])                         # (th_out, w_out, chid) f32

    # ---- 1x1 projection conv (MXU) + BN bias [+ residual, exact f32] ----
    y = jnp.dot(h2.reshape(th_out * w_out, chid).astype(compute_dtype),
                w2_ref[...], preferred_element_type=jnp.float32)
    y = y + b3_ref[...]
    if use_res:
        res = x_ref[0, pad:pad + th_out, 0:w_out, :]
        y = y + res.reshape(th_out * w_out, coutp)
    o_ref[0] = y.reshape(th_out, w_out, coutp).astype(o_ref.dtype)


def inverted_residual_pallas(x_nchw, params, *, ksize, pad, stride,
                             expand_ratio, compute_dtype=jnp.bfloat16,
                             row_tile=None):
    """Fused InvertedResidual forward.  x_nchw: (N, Cin, H, W) float32."""
    N, Cin, H, W = x_nchw.shape
    has_expand = expand_ratio != 1
    if has_expand:
        w1, s1, b1, wdw, s2, b2, w2, s3, b3 = params
        Chid = w1.shape[1]
    else:
        wdw, s2, b2, w2, s3, b3 = params
        Chid = wdw.shape[2]
        assert Chid == Cin
    Cout = w2.shape[1]

    Hout = (H + 2 * pad - ksize) // stride + 1
    Wout = (W + 2 * pad - ksize) // stride + 1
    assert Hout >= 1 and Wout >= 1
    use_res = (stride == 1 and Cin == Cout)
    if use_res:
        # PyTorch adds x + conv(x); that only shape-checks for 'same' padding.
        assert Hout == H and Wout == W, \
            "residual connection requires 2*pad == ksize - 1"

    # ---- lane-pad every channel dim to a multiple of 128 and fold the BN
    #      scales into the conv weights (only the bias add stays in-kernel).
    Cp_in, Cp_hid, Cp_out = (_round_up(c, LANE) for c in (Cin, Chid, Cout))

    def padc(a, axis, target):
        widths = [(0, 0)] * a.ndim
        widths[axis] = (0, target - a.shape[axis])
        return jnp.pad(a, widths)

    if has_expand:
        w1f = padc(padc(w1 * s1, 1, Cp_hid), 0, Cp_in).astype(compute_dtype)
        b1f = padc(b1, 1, Cp_hid)
    wdwf = padc(wdw * s2, 2, Cp_hid)                  # stays f32 (VPU work)
    b2f = padc(b2, 1, Cp_hid)
    w2f = padc(padc(w2 * s3, 1, Cp_out), 0, Cp_hid).astype(compute_dtype)
    b3f = padc(b3, 1, Cp_out)

    # ---- NCHW -> NHWC, lane-pad channels, pre-pad H, build overlapping row
    #      tiles (halo rows) in the wrapper so the kernel only needs plain
    #      Blocked BlockSpecs with automatic double-buffering.
    x_nhwc = padc(jnp.transpose(x_nchw, (0, 2, 3, 1)), 3, Cp_in)
    x_padh = jnp.pad(x_nhwc, ((0, 0), (pad, pad), (0, 0), (0, 0)))

    TH = row_tile if row_tile is not None else _pick_row_tile(Hout)
    assert Hout % TH == 0, "row tile must divide Hout"
    n_t = Hout // TH
    TH_in = (TH - 1) * stride + ksize
    assert pad <= TH * stride      # halo zeroing only touches edge tiles
    # trace-time guards: depthwise window reads stay inside the scratch
    assert (ksize - 1) + stride * (TH - 1) <= TH_in - 1
    assert (ksize - 1) + stride * (Wout - 1) <= W + 2 * pad - 1

    x_tiles = jnp.stack(
        [lax.slice_in_dim(x_padh, t * TH * stride, t * TH * stride + TH_in,
                          axis=1)
         for t in range(n_t)], axis=1)
    x_tiles = x_tiles.reshape(N * n_t, TH_in, W, Cp_in)

    WL = _round_up(pad, SUBLANE)   # sublane-aligned column where data starts
    WS = WL + W + pad
    top_zero = pad
    bottom_zero = max(0, (Hout - 1) * stride + ksize - pad - H)

    kernel = functools.partial(
        _inverted_residual_kernel, ksize=ksize, pad=pad, stride=stride,
        wl=WL, th_out=TH, w_out=Wout, top_zero=top_zero,
        bottom_zero=bottom_zero, use_res=use_res, has_expand=has_expand,
        compute_dtype=compute_dtype)

    rep2 = lambda n, t: (0, 0)
    rep3 = lambda n, t: (0, 0, 0)

    in_arrays = [x_tiles]
    in_specs = [pl.BlockSpec((1, TH_in, W, Cp_in),
                             lambda n, t: (n * n_t + t, 0, 0, 0))]
    if has_expand:
        in_arrays += [w1f, b1f]
        in_specs += [pl.BlockSpec((Cp_in, Cp_hid), rep2),
                     pl.BlockSpec((1, Cp_hid), rep2)]
    in_arrays += [wdwf, b2f, w2f, b3f]
    in_specs += [pl.BlockSpec((ksize, ksize, Cp_hid), rep3),
                 pl.BlockSpec((1, Cp_hid), rep2),
                 pl.BlockSpec((Cp_hid, Cp_out), rep2),
                 pl.BlockSpec((1, Cp_out), rep2)]

    # rough per-step VMEM watermark -> explicit scoped-VMEM limit
    csize = 2 if compute_dtype == jnp.bfloat16 else 4
    est = (2 * TH_in * W * Cp_in * 4            # double-buffered input tile
           + 2 * TH * Wout * Cp_out * 4         # double-buffered output tile
           + TH_in * WS * Cp_hid * 4            # padded depthwise scratch
           + TH * Wout * Cp_hid * 4             # accumulator scratch
           + (Cp_in * Cp_hid + Cp_hid * Cp_out) * csize
           + (ksize * ksize + 2) * Cp_hid * 4 + Cp_out * 4)
    vmem_limit = int(min(max(2 * est, 32 * 1024 * 1024), 64 * 1024 * 1024))

    out = pl.pallas_call(
        kernel,
        out_shape=jax.ShapeDtypeStruct((N, Hout, Wout, Cp_out), jnp.float32),
        grid_spec=pltpu.PrefetchScalarGridSpec(
            num_scalar_prefetch=0,
            grid=(N, n_t),
            in_specs=in_specs,
            out_specs=pl.BlockSpec((1, TH, Wout, Cp_out),
                                   lambda n, t: (n, t, 0, 0)),
            scratch_shapes=[
                pltpu.VMEM((TH_in, WS, Cp_hid), jnp.float32),   # padded act
                pltpu.VMEM((TH, Wout, Cp_hid), jnp.float32),    # dw accum
            ]),
        compiler_params=pltpu.CompilerParams(
            dimension_semantics=("parallel", "parallel"),
            vmem_limit_bytes=vmem_limit),
    )(*in_arrays)

    out = out[:, :, :, :Cout]                   # drop lane padding
    return jnp.transpose(out, (0, 3, 1, 2))     # back to NCHW


# --------------------------- test scaffolding ---------------------------

def _fold_bn(gamma, beta, mean, var, eps=1e-5):
    scale = gamma / jnp.sqrt(var + eps)
    bias = beta - mean * scale
    return scale[None, :], bias[None, :]


def _make_params(key, inp, oup, ksize, expand_ratio):
    hid = inp * expand_ratio
    ks = jax.random.split(key, 12)
    wdw = jax.random.normal(ks[1], (ksize, ksize, hid), jnp.float32) * 0.2
    w2 = jax.random.normal(ks[2], (hid, oup), jnp.float32) * 0.2

    def bn(k0, k1, k2, k3, c):
        gamma = 1.0 + 0.1 * jax.random.normal(k0, (c,), jnp.float32)
        beta = 0.1 * jax.random.normal(k1, (c,), jnp.float32)
        mean = 0.1 * jax.random.normal(k2, (c,), jnp.float32)
        var = 0.5 + jax.random.uniform(k3, (c,), jnp.float32)
        return _fold_bn(gamma, beta, mean, var)

    s2, b2 = bn(ks[7], ks[8], ks[9], ks[10], hid)
    s3, b3 = bn(ks[11], ks[3], ks[5], ks[7], oup)
    if expand_ratio == 1:
        return (wdw, s2, b2, w2, s3, b3)
    w1 = jax.random.normal(ks[0], (inp, hid), jnp.float32) * 0.2
    s1, b1 = bn(ks[3], ks[4], ks[5], ks[6], hid)
    return (w1, s1, b1, wdw, s2, b2, w2, s3, b3)


def _reference(x_nchw, params, *, ksize, pad, stride, expand_ratio,
               compute_dtype=jnp.float32):
    """Plain-JAX NHWC reference of the PyTorch forward (eval-mode BN), with the
    BN scale folded into the conv weights and matmul operands cast to
    `compute_dtype` exactly as the Pallas kernel does."""
    x = jnp.transpose(x_nchw, (0, 2, 3, 1))
    if expand_ratio != 1:
        w1, s1, b1, wdw, s2, b2, w2, s3, b3 = params
        h = jnp.einsum("nhwc,cd->nhwd", x.astype(compute_dtype),
                       (w1 * s1).astype(compute_dtype),
                       preferred_element_type=jnp.float32)
        h = _relu6(h + b1)
    else:
        wdw, s2, b2, w2, s3, b3 = params
        h = x
    chid = wdw.shape[-1]
    hd = lax.conv_general_dilated(
        h, (wdw * s2)[:, :, None, :],
        window_strides=(stride, stride),
        padding=[(pad, pad), (pad, pad)],
        dimension_numbers=("NHWC", "HWIO", "NHWC"),
        feature_group_count=chid)
    hd = _relu6(hd + b2)
    y = jnp.einsum("nhwc,cd->nhwd", hd.astype(compute_dtype),
                   (w2 * s3).astype(compute_dtype),
                   preferred_element_type=jnp.float32)
    y = y + b3
    if stride == 1 and x.shape[-1] == y.shape[-1]:
        y = y + x
    return jnp.transpose(y, (0, 3, 1, 2))


if __name__ == "__main__":
    key = jax.random.PRNGKey(0)
    kx1, kp1, kx2, kp2 = jax.random.split(key, 4)

    # ---- config 1: expand_ratio > 1 path (expand + dw + project + residual)
    N, Cin, H, W = 2, 4, 16, 16
    Cout, ksize, pad, stride, expand_ratio = 4, 3, 1, 1, 4
    x = jax.random.normal(kx1, (N, Cin, H, W), jnp.float32)
    params = _make_params(kp1, Cin, Cout, ksize, expand_ratio)

    # strict structural/halo verification in f32
    out_f32 = jax.block_until_ready(inverted_residual_pallas(
        x, params, ksize=ksize, pad=pad, stride=stride,
        expand_ratio=expand_ratio, compute_dtype=jnp.float32))
    ref_f32 = _reference(x, params, ksize=ksize, pad=pad, stride=stride,
                         expand_ratio=expand_ratio,
                         compute_dtype=jnp.float32)
    assert out_f32.shape == ref_f32.shape
    err = float(jnp.max(jnp.abs(out_f32 - ref_f32)))
    assert err < 1e-4, f"f32 expand-path mismatch: {err}"

    # perf-default path: bf16 MXU operands, f32 accumulation.  Looser bound
    # absorbs rare double-rounding divergence of jittered intermediates.
    out_bf16 = jax.block_until_ready(inverted_residual_pallas(
        x, params, ksize=ksize, pad=pad, stride=stride,
        expand_ratio=expand_ratio, compute_dtype=jnp.bfloat16))
    ref_bf16 = _reference(x, params, ksize=ksize, pad=pad, stride=stride,
                          expand_ratio=expand_ratio,
                          compute_dtype=jnp.bfloat16)
    err_b = float(jnp.max(jnp.abs(out_bf16 - ref_bf16)))
    assert err_b < 3e-2, f"bf16 expand-path mismatch: {err_b}"

    # ---- config 2: expand_ratio == 1 path (dw + project + residual) ----
    x2 = jax.random.normal(kx2, (N, Cin, H, W), jnp.float32)
    params2 = _make_params(kp2, Cin, Cout, ksize, 1)
    out2 = jax.block_until_ready(inverted_residual_pallas(
        x2, params2, ksize=ksize, pad=pad, stride=stride,
        expand_ratio=1, compute_dtype=jnp.float32))
    ref2 = _reference(x2, params2, ksize=ksize, pad=pad, stride=stride,
                      expand_ratio=1, compute_dtype=jnp.float32)
    err2 = float(jnp.max(jnp.abs(out2 - ref2)))
    assert err2 < 1e-4, f"expand_ratio=1 path mismatch: {err2}"

    print("KERNEL_OK")
</pallas_src>

<mosaic_0001>
module attributes {stable_mosaic.version = 11 : i64} {
  func.func @_inverted_residual_kernel(%arg0: i32, %arg1: i32, %arg2: memref<1x10x16x128xf32, #tpu.memory_space<vmem>>, %arg3: memref<128x128xf32, #tpu.memory_space<vmem>>, %arg4: memref<1x128xf32, #tpu.memory_space<vmem>>, %arg5: memref<3x3x128xf32, #tpu.memory_space<vmem>>, %arg6: memref<1x128xf32, #tpu.memory_space<vmem>>, %arg7: memref<128x128xf32, #tpu.memory_space<vmem>>, %arg8: memref<1x128xf32, #tpu.memory_space<vmem>>, %arg9: memref<1x8x16x128xf32, #tpu.memory_space<vmem>>, %arg10: memref<10x25x128xf32, #tpu.memory_space<vmem>>, %arg11: memref<8x16x128xf32, #tpu.memory_space<vmem>>) attributes {dimension_semantics = [#tpu.dimension_semantics<parallel>, #tpu.dimension_semantics<parallel>], iteration_bounds = array<i64: 2, 2>, scalar_prefetch = 0 : i64, scratch_operands = 2 : i64, tpu.core_type = #tpu.core_type<tc>, window_params = [{transform_indices = @transform_0, window_bounds = array<i64: 1, 10, 16, 128>}, {pipeline_mode = #tpu.pipeline_mode<synchronous>, transform_indices = @transform_1, window_bounds = array<i64: 128, 128>}, {pipeline_mode = #tpu.pipeline_mode<synchronous>, transform_indices = @transform_2, window_bounds = array<i64: 1, 128>}, {pipeline_mode = #tpu.pipeline_mode<synchronous>, transform_indices = @transform_3, window_bounds = array<i64: 3, 3, 128>}, {pipeline_mode = #tpu.pipeline_mode<synchronous>, transform_indices = @transform_4, window_bounds = array<i64: 1, 128>}, {pipeline_mode = #tpu.pipeline_mode<synchronous>, transform_indices = @transform_5, window_bounds = array<i64: 128, 128>}, {pipeline_mode = #tpu.pipeline_mode<synchronous>, transform_indices = @transform_6, window_bounds = array<i64: 1, 128>}, {transform_indices = @transform_7, window_bounds = array<i64: 1, 8, 16, 128>}]} {
    %c0 = arith.constant 0 : index
    %c0_0 = arith.constant 0 : index
    %c0_1 = arith.constant 0 : index
    %c0_2 = arith.constant 0 : index
    %0 = vector.load %arg2[%c0, %c0_0, %c0_1, %c0_2] : memref<1x10x16x128xf32, #tpu.memory_space<vmem>>, vector<1x10x16x128xf32>
    %1 = vector.shape_cast %0 : vector<1x10x16x128xf32> to vector<10x16x128xf32>
    %2 = vector.shape_cast %1 : vector<10x16x128xf32> to vector<160x128xf32>
    %c0_3 = arith.constant 0 : index
    %c0_4 = arith.constant 0 : index
    %3 = vector.load %arg3[%c0_3, %c0_4] : memref<128x128xf32, #tpu.memory_space<vmem>>, vector<128x128xf32>
    %cst = arith.constant dense<0.000000e+00> : vector<160x128xf32>
    %4 = tpu.matmul %2, %3, %cst {dimension_numbers = #tpu.dot_dimension_numbers<[1], [0], [0], [1], [0, 0, 1, 1], [], []>} : vector<160x128xf32>, vector<128x128xf32>, vector<160x128xf32> -> vector<160x128xf32>
    %c0_5 = arith.constant 0 : index
    %c0_6 = arith.constant 0 : index
    %5 = vector.load %arg4[%c0_5, %c0_6] : memref<1x128xf32, #tpu.memory_space<vmem>>, vector<1x128xf32>
    %6 = vector.broadcast %5 : vector<1x128xf32> to vector<160x128xf32>
    %7 = arith.addf %4, %6 : vector<160x128xf32>
    %cst_7 = arith.constant 0.000000e+00 : f32
    %8 = vector.broadcast %cst_7 : f32 to vector<160x128xf32>
    %9 = arith.maximumf %7, %8 : vector<160x128xf32>
    %cst_8 = arith.constant 6.000000e+00 : f32
    %10 = vector.broadcast %cst_8 : f32 to vector<160x128xf32>
    %11 = arith.minimumf %9, %10 : vector<160x128xf32>
    %12 = vector.shape_cast %11 : vector<160x128xf32> to vector<10x16x128xf32>
    %c0_9 = arith.constant 0 : index
    %c8 = arith.constant 8 : index
    %c0_10 = arith.constant 0 : index
    %13 = vector.load %arg10[%c0_9, %c8, %c0_10] : memref<10x25x128xf32, #tpu.memory_space<vmem>>, vector<10x16x128xf32>
    tpu.vector_store %arg10[%c0_9, %c8, %c0_10], %12 {strides = array<i32>} : memref<10x25x128xf32, #tpu.memory_space<vmem>>, vector<10x16x128xf32>,
    %cst_11 = arith.constant 0.000000e+00 : f32
    %14 = vector.broadcast %cst_11 : f32 to vector<10x1x128xf32>
    %c0_12 = arith.constant 0 : index
    %c7 = arith.constant 7 : index
    %c0_13 = arith.constant 0 : index
    %15 = vector.load %arg10[%c0_12, %c7, %c0_13] : memref<10x25x128xf32, #tpu.memory_space<vmem>>, vector<10x1x128xf32>
    tpu.vector_store %arg10[%c0_12, %c7, %c0_13], %14 {strides = array<i32>} : memref<10x25x128xf32, #tpu.memory_space<vmem>>, vector<10x1x128xf32>,
    %c0_14 = arith.constant 0 : index
    %c24 = arith.constant 24 : index
    %c0_15 = arith.constant 0 : index
    %16 = vector.load %arg10[%c0_14, %c24, %c0_15] : memref<10x25x128xf32, #tpu.memory_space<vmem>>, vector<10x1x128xf32>
    tpu.vector_store %arg10[%c0_14, %c24, %c0_15], %14 {strides = array<i32>} : memref<10x25x128xf32, #tpu.memory_space<vmem>>, vector<10x1x128xf32>,
    %c0_i32 = arith.constant 0 : i32
    %17 = arith.cmpi eq, %arg1, %c0_i32 : i32
    %18 = arith.extui %17 : i1 to i32
    %c0_i32_16 = arith.constant 0 : i32
    %19 = arith.cmpi ne, %18, %c0_i32_16 : i32
    scf.if %19 {
      %cst_122 = arith.constant 0.000000e+00 : f32
      %129 = vector.broadcast %cst_122 : f32 to vector<1x25x128xf32>
      %c0_123 = arith.constant 0 : index
      %c0_124 = arith.constant 0 : index
      %c0_125 = arith.constant 0 : index
      %130 = vector.load %arg10[%c0_123, %c0_124, %c0_125] : memref<10x25x128xf32, #tpu.memory_space<vmem>>, vector<1x25x128xf32>
      tpu.vector_store %arg10[%c0_123, %c0_124, %c0_125], %129 {strides = array<i32>} : memref<10x25x128xf32, #tpu.memory_space<vmem>>, vector<1x25x128xf32>,
    } else {
    }
    %c1_i32 = arith.constant 1 : i32
    %20 = arith.cmpi eq, %arg1, %c1_i32 : i32
    %21 = arith.extui %20 : i1 to i32
    %c0_i32_17 = arith.constant 0 : i32
    %22 = arith.cmpi ne, %21, %c0_i32_17 : i32
    scf.if %22 {
      %cst_122 = arith.constant 0.000000e+00 : f32
      %129 = vector.broadcast %cst_122 : f32 to vector<1x25x128xf32>
      %c9_123 = arith.constant 9 : index
      %c0_124 = arith.constant 0 : index
      %c0_125 = arith.constant 0 : index
      %130 = vector.load %arg10[%c9_123, %c0_124, %c0_125] : memref<10x25x128xf32, #tpu.memory_space<vmem>>, vector<1x25x128xf32>
      tpu.vector_store %arg10[%c9_123, %c0_124, %c0_125], %129 {strides = array<i32>} : memref<10x25x128xf32, #tpu.memory_space<vmem>>, vector<1x25x128xf32>,
    } else {
    }
    %c0_18 = arith.constant 0 : index
    %c0_19 = arith.constant 0 : index
    %c0_20 = arith.constant 0 : index
    %23 = vector.load %arg5[%c0_18, %c0_19, %c0_20] : memref<3x3x128xf32, #tpu.memory_space<vmem>>, vector<3x3x128xf32>
    %c0_21 = arith.constant 0 : index
    %c0_22 = arith.constant 0 : index
    %24 = vector.load %arg6[%c0_21, %c0_22] : memref<1x128xf32, #tpu.memory_space<vmem>>, vector<1x128xf32>
    %25 = vector.shape_cast %24 : vector<1x128xf32> to vector<1x1x128xf32>
    %26 = vector.shape_cast %25 : vector<1x1x128xf32> to vector<1x1x128xf32>
    %27 = vector.broadcast %26 : vector<1x1x128xf32> to vector<8x16x128xf32>
    %c0_23 = arith.constant 0 : index
    %c0_24 = arith.constant 0 : index
    %c0_25 = arith.constant 0 : index
    %28 = vector.load %arg11[%c0_23, %c0_24, %c0_25] : memref<8x16x128xf32, #tpu.memory_space<vmem>>, vector<8x16x128xf32>
    tpu.vector_store %arg11[%c0_23, %c0_24, %c0_25], %27 {strides = array<i32>} : memref<8x16x128xf32, #tpu.memory_space<vmem>>, vector<8x16x128xf32>,
    %c0_26 = arith.constant 0 : index
    %c7_27 = arith.constant 7 : index
    %c0_28 = arith.constant 0 : index
    %29 = vector.load %arg10[%c0_26, %c7_27, %c0_28] : memref<10x25x128xf32, #tpu.memory_space<vmem>>, vector<8x16x128xf32>
    %c0_29 = arith.constant 0 : index
    %c0_30 = arith.constant 0 : index
    %c0_31 = arith.constant 0 : index
    %30 = vector.load %arg11[%c0_29, %c0_30, %c0_31] : memref<8x16x128xf32, #tpu.memory_space<vmem>>, vector<8x16x128xf32>
    %31 = vector.extract_strided_slice %23 {offsets = [0, 0, 0], sizes = [1, 1, 128], strides = [1, 1, 1]} : vector<3x3x128xf32> to vector<1x1x128xf32>
    %32 = vector.shape_cast %31 : vector<1x1x128xf32> to vector<128xf32>
    %33 = vector.shape_cast %32 : vector<128xf32> to vector<1x1x128xf32>
    %34 = vector.broadcast %33 : vector<1x1x128xf32> to vector<8x16x128xf32>
    %35 = arith.mulf %29, %34 : vector<8x16x128xf32>
    %36 = arith.addf %30, %35 : vector<8x16x128xf32>
    %c0_32 = arith.constant 0 : index
    %c0_33 = arith.constant 0 : index
    %c0_34 = arith.constant 0 : index
    %37 = vector.load %arg11[%c0_32, %c0_33, %c0_34] : memref<8x16x128xf32, #tpu.memory_space<vmem>>, vector<8x16x128xf32>
    tpu.vector_store %arg11[%c0_32, %c0_33, %c0_34], %36 {strides = array<i32>} : memref<8x16x128xf32, #tpu.memory_space<vmem>>, vector<8x16x128xf32>,
    %c0_35 = arith.constant 0 : index
    %c8_36 = arith.constant 8 : index
    %c0_37 = arith.constant 0 : index
    %38 = vector.load %arg10[%c0_35, %c8_36, %c0_37] : memref<10x25x128xf32, #tpu.memory_space<vmem>>, vector<8x16x128xf32>
    %c0_38 = arith.constant 0 : index
    %c0_39 = arith.constant 0 : index
    %c0_40 = arith.constant 0 : index
    %39 = vector.load %arg11[%c0_38, %c0_39, %c0_40] : memref<8x16x128xf32, #tpu.memory_space<vmem>>, vector<8x16x128xf32>
    %40 = vector.extract_strided_slice %23 {offsets = [0, 1, 0], sizes = [1, 1, 128], strides = [1, 1, 1]} : vector<3x3x128xf32> to vector<1x1x128xf32>
    %41 = vector.shape_cast %40 : vector<1x1x128xf32> to vector<128xf32>
    %42 = vector.shape_cast %41 : vector<128xf32> to vector<1x1x128xf32>
    %43 = vector.broadcast %42 : vector<1x1x128xf32> to vector<8x16x128xf32>
    %44 = arith.mulf %38, %43 : vector<8x16x128xf32>
    %45 = arith.addf %39, %44 : vector<8x16x128xf32>
    %c0_41 = arith.constant 0 : index
    %c0_42 = arith.constant 0 : index
    %c0_43 = arith.constant 0 : index
    %46 = vector.load %arg11[%c0_41, %c0_42, %c0_43] : memref<8x16x128xf32, #tpu.memory_space<vmem>>, vector<8x16x128xf32>
    tpu.vector_store %arg11[%c0_41, %c0_42, %c0_43], %45 {strides = array<i32>} : memref<8x16x128xf32, #tpu.memory_space<vmem>>, vector<8x16x128xf32>,
    %c0_44 = arith.constant 0 : index
    %c9 = arith.constant 9 : index
    %c0_45 = arith.constant 0 : index
    %47 = vector.load %arg10[%c0_44, %c9, %c0_45] : memref<10x25x128xf32, #tpu.memory_space<vmem>>, vector<8x16x128xf32>
    %c0_46 = arith.constant 0 : index
    %c0_47 = arith.constant 0 : index
    %c0_48 = arith.constant 0 : index
    %48 = vector.load %arg11[%c0_46, %c0_47, %c0_48] : memref<8x16x128xf32, #tpu.memory_space<vmem>>, vector<8x16x128xf32>
    %49 = vector.extract_strided_slice %23 {offsets = [0, 2, 0], sizes = [1, 1, 128], strides = [1, 1, 1]} : vector<3x3x128xf32> to vector<1x1x128xf32>
    %50 = vector.shape_cast %49 : vector<1x1x128xf32> to vector<128xf32>
    %51 = vector.shape_cast %50 : vector<128xf32> to vector<1x1x128xf32>
    %52 = vector.broadcast %51 : vector<1x1x128xf32> to vector<8x16x128xf32>
    %53 = arith.mulf %47, %52 : vector<8x16x128xf32>
    %54 = arith.addf %48, %53 : vector<8x16x128xf32>
    %c0_49 = arith.constant 0 : index
    %c0_50 = arith.constant 0 : index
    %c0_51 = arith.constant 0 : index
    %55 = vector.load %arg11[%c0_49, %c0_50, %c0_51] : memref<8x16x128xf32, #tpu.memory_space<vmem>>, vector<8x16x128xf32>
    tpu.vector_store %arg11[%c0_49, %c0_50, %c0_51], %54 {strides = array<i32>} : memref<8x16x128xf32, #tpu.memory_space<vmem>>, vector<8x16x128xf32>,
    %c1 = arith.constant 1 : index
    %c7_52 = arith.constant 7 : index
    %c0_53 = arith.constant 0 : index
    %56 = vector.load %arg10[%c1, %c7_52, %c0_53] : memref<10x25x128xf32, #tpu.memory_space<vmem>>, vector<8x16x128xf32>
    %c0_54 = arith.constant 0 : index
    %c0_55 = arith.constant 0 : index
    %c0_56 = arith.constant 0 : index
    %57 = vector.load %arg11[%c0_54, %c0_55, %c0_56] : memref<8x16x128xf32, #tpu.memory_space<vmem>>, vector<8x16x128xf32>
    %58 = vector.extract_strided_slice %23 {offsets = [1, 0, 0], sizes = [1, 1, 128], strides = [1, 1, 1]} : vector<3x3x128xf32> to vector<1x1x128xf32>
    %59 = vector.shape_cast %58 : vector<1x1x128xf32> to vector<128xf32>
    %60 = vector.shape_cast %59 : vector<128xf32> to vector<1x1x128xf32>
    %61 = vector.broadcast %60 : vector<1x1x128xf32> to vector<8x16x128xf32>
    %62 = arith.mulf %56, %61 : vector<8x16x128xf32>
    %63 = arith.addf %57, %62 : vector<8x16x128xf32>
    %c0_57 = arith.constant 0 : index
    %c0_58 = arith.constant 0 : index
    %c0_59 = arith.constant 0 : index
    %64 = vector.load %arg11[%c0_57, %c0_58, %c0_59] : memref<8x16x128xf32, #tpu.memory_space<vmem>>, vector<8x16x128xf32>
    tpu.vector_store %arg11[%c0_57, %c0_58, %c0_59], %63 {strides = array<i32>} : memref<8x16x128xf32, #tpu.memory_space<vmem>>, vector<8x16x128xf32>,
    %c1_60 = arith.constant 1 : index
    %c8_61 = arith.constant 8 : index
    %c0_62 = arith.constant 0 : index
    %65 = vector.load %arg10[%c1_60, %c8_61, %c0_62] : memref<10x25x128xf32, #tpu.memory_space<vmem>>, vector<8x16x128xf32>
    %c0_63 = arith.constant 0 : index
    %c0_64 = arith.constant 0 : index
    %c0_65 = arith.constant 0 : index
    %66 = vector.load %arg11[%c0_63, %c0_64, %c0_65] : memref<8x16x128xf32, #tpu.memory_space<vmem>>, vector<8x16x128xf32>
    %67 = vector.extract_strided_slice %23 {offsets = [1, 1, 0], sizes = [1, 1, 128], strides = [1, 1, 1]} : vector<3x3x128xf32> to vector<1x1x128xf32>
    %68 = vector.shape_cast %67 : vector<1x1x128xf32> to vector<128xf32>
    %69 = vector.shape_cast %68 : vector<128xf32> to vector<1x1x128xf32>
    %70 = vector.broadcast %69 : vector<1x1x128xf32> to vector<8x16x128xf32>
    %71 = arith.mulf %65, %70 : vector<8x16x128xf32>
    %72 = arith.addf %66, %71 : vector<8x16x128xf32>
    %c0_66 = arith.constant 0 : index
    %c0_67 = arith.constant 0 : index
    %c0_68 = arith.constant 0 : index
    %73 = vector.load %arg11[%c0_66, %c0_67, %c0_68] : memref<8x16x128xf32, #tpu.memory_space<vmem>>, vector<8x16x128xf32>
    tpu.vector_store %arg11[%c0_66, %c0_67, %c0_68], %72 {strides = array<i32>} : memref<8x16x128xf32, #tpu.memory_space<vmem>>, vector<8x16x128xf32>,
    %c1_69 = arith.constant 1 : index
    %c9_70 = arith.constant 9 : index
    %c0_71 = arith.constant 0 : index
    %74 = vector.load %arg10[%c1_69, %c9_70, %c0_71] : memref<10x25x128xf32, #tpu.memory_space<vmem>>, vector<8x16x128xf32>
    %c0_72 = arith.constant 0 : index
    %c0_73 = arith.constant 0 : index
    %c0_74 = arith.constant 0 : index
    %75 = vector.load %arg11[%c0_72, %c0_73, %c0_74] : memref<8x16x128xf32, #tpu.memory_space<vmem>>, vector<8x16x128xf32>
    %76 = vector.extract_strided_slice %23 {offsets = [1, 2, 0], sizes = [1, 1, 128], strides = [1, 1, 1]} : vector<3x3x128xf32> to vector<1x1x128xf32>
    %77 = vector.shape_cast %76 : vector<1x1x128xf32> to vector<128xf32>
    %78 = vector.shape_cast %77 : vector<128xf32> to vector<1x1x128xf32>
    %79 = vector.broadcast %78 : vector<1x1x128xf32> to vector<8x16x128xf32>
    %80 = arith.mulf %74, %79 : vector<8x16x128xf32>
    %81 = arith.addf %75, %80 : vector<8x16x128xf32>
    %c0_75 = arith.constant 0 : index
    %c0_76 = arith.constant 0 : index
    %c0_77 = arith.constant 0 : index
    %82 = vector.load %arg11[%c0_75, %c0_76, %c0_77] : memref<8x16x128xf32, #tpu.memory_space<vmem>>, vector<8x16x128xf32>
    tpu.vector_store %arg11[%c0_75, %c0_76, %c0_77], %81 {strides = array<i32>} : memref<8x16x128xf32, #tpu.memory_space<vmem>>, vector<8x16x128xf32>,
    %c2 = arith.constant 2 : index
    %c7_78 = arith.constant 7 : index
    %c0_79 = arith.constant 0 : index
    %83 = vector.load %arg10[%c2, %c7_78, %c0_79] : memref<10x25x128xf32, #tpu.memory_space<vmem>>, vector<8x16x128xf32>
    %c0_80 = arith.constant 0 : index
    %c0_81 = arith.constant 0 : index
    %c0_82 = arith.constant 0 : index
    %84 = vector.load %arg11[%c0_80, %c0_81, %c0_82] : memref<8x16x128xf32, #tpu.memory_space<vmem>>, vector<8x16x128xf32>
    %85 = vector.extract_strided_slice %23 {offsets = [2, 0, 0], sizes = [1, 1, 128], strides = [1, 1, 1]} : vector<3x3x128xf32> to vector<1x1x128xf32>
    %86 = vector.shape_cast %85 : vector<1x1x128xf32> to vector<128xf32>
    %87 = vector.shape_cast %86 : vector<128xf32> to vector<1x1x128xf32>
    %88 = vector.broadcast %87 : vector<1x1x128xf32> to vector<8x16x128xf32>
    %89 = arith.mulf %83, %88 : vector<8x16x128xf32>
    %90 = arith.addf %84, %89 : vector<8x16x128xf32>
    %c0_83 = arith.constant 0 : index
    %c0_84 = arith.constant 0 : index
    %c0_85 = arith.constant 0 : index
    %91 = vector.load %arg11[%c0_83, %c0_84, %c0_85] : memref<8x16x128xf32, #tpu.memory_space<vmem>>, vector<8x16x128xf32>
    tpu.vector_store %arg11[%c0_83, %c0_84, %c0_85], %90 {strides = array<i32>} : memref<8x16x128xf32, #tpu.memory_space<vmem>>, vector<8x16x128xf32>,
    %c2_86 = arith.constant 2 : index
    %c8_87 = arith.constant 8 : index
    %c0_88 = arith.constant 0 : index
    %92 = vector.load %arg10[%c2_86, %c8_87, %c0_88] : memref<10x25x128xf32, #tpu.memory_space<vmem>>, vector<8x16x128xf32>
    %c0_89 = arith.constant 0 : index
    %c0_90 = arith.constant 0 : index
    %c0_91 = arith.constant 0 : index
    %93 = vector.load %arg11[%c0_89, %c0_90, %c0_91] : memref<8x16x128xf32, #tpu.memory_space<vmem>>, vector<8x16x128xf32>
    %94 = vector.extract_strided_slice %23 {offsets = [2, 1, 0], sizes = [1, 1, 128], strides = [1, 1, 1]} : vector<3x3x128xf32> to vector<1x1x128xf32>
    %95 = vector.shape_cast %94 : vector<1x1x128xf32> to vector<128xf32>
    %96 = vector.shape_cast %95 : vector<128xf32> to vector<1x1x128xf32>
    %97 = vector.broadcast %96 : vector<1x1x128xf32> to vector<8x16x128xf32>
    %98 = arith.mulf %92, %97 : vector<8x16x128xf32>
    %99 = arith.addf %93, %98 : vector<8x16x128xf32>
    %c0_92 = arith.constant 0 : index
    %c0_93 = arith.constant 0 : index
    %c0_94 = arith.constant 0 : index
    %100 = vector.load %arg11[%c0_92, %c0_93, %c0_94] : memref<8x16x128xf32, #tpu.memory_space<vmem>>, vector<8x16x128xf32>
    tpu.vector_store %arg11[%c0_92, %c0_93, %c0_94], %99 {strides = array<i32>} : memref<8x16x128xf32, #tpu.memory_space<vmem>>, vector<8x16x128xf32>,
    %c2_95 = arith.constant 2 : index
    %c9_96 = arith.constant 9 : index
    %c0_97 = arith.constant 0 : index
    %101 = vector.load %arg10[%c2_95, %c9_96, %c0_97] : memref<10x25x128xf32, #tpu.memory_space<vmem>>, vector<8x16x128xf32>
    %c0_98 = arith.constant 0 : index
    %c0_99 = arith.constant 0 : index
    %c0_100 = arith.constant 0 : index
    %102 = vector.load %arg11[%c0_98, %c0_99, %c0_100] : memref<8x16x128xf32, #tpu.memory_space<vmem>>, vector<8x16x128xf32>
    %103 = vector.extract_strided_slice %23 {offsets = [2, 2, 0], sizes = [1, 1, 128], strides = [1, 1, 1]} : vector<3x3x128xf32> to vector<1x1x128xf32>
    %104 = vector.shape_cast %103 : vector<1x1x128xf32> to vector<128xf32>
    %105 = vector.shape_cast %104 : vector<128xf32> to vector<1x1x128xf32>
    %106 = vector.broadcast %105 : vector<1x1x128xf32> to vector<8x16x128xf32>
    %107 = arith.mulf %101, %106 : vector<8x16x128xf32>
    %108 = arith.addf %102, %107 : vector<8x16x128xf32>
    %c0_101 = arith.constant 0 : index
    %c0_102 = arith.constant 0 : index
    %c0_103 = arith.constant 0 : index
    %109 = vector.load %arg11[%c0_101, %c0_102, %c0_103] : memref<8x16x128xf32, #tpu.memory_space<vmem>>, vector<8x16x128xf32>
    tpu.vector_store %arg11[%c0_101, %c0_102, %c0_103], %108 {strides = array<i32>} : memref<8x16x128xf32, #tpu.memory_space<vmem>>, vector<8x16x128xf32>,
    %c0_104 = arith.constant 0 : index
    %c0_105 = arith.constant 0 : index
    %c0_106 = arith.constant 0 : index
    %110 = vector.load %arg11[%c0_104, %c0_105, %c0_106] : memref<8x16x128xf32, #tpu.memory_space<vmem>>, vector<8x16x128xf32>
    %cst_107 = arith.constant 0.000000e+00 : f32
    %111 = vector.broadcast %cst_107 : f32 to vector<8x16x128xf32>
    %112 = arith.maximumf %110, %111 : vector<8x16x128xf32>
    %cst_108 = arith.constant 6.000000e+00 : f32
    %113 = vector.broadcast %cst_108 : f32 to vector<8x16x128xf32>
    %114 = arith.minimumf %112, %113 : vector<8x16x128xf32>
    %115 = vector.shape_cast %114 : vector<8x16x128xf32> to vector<128x128xf32>
    %c0_109 = arith.constant 0 : index
    %c0_110 = arith.constant 0 : index
    %116 = vector.load %arg7[%c0_109, %c0_110] : memref<128x128xf32, #tpu.memory_space<vmem>>, vector<128x128xf32>
    %cst_111 = arith.constant dense<0.000000e+00> : vector<128x128xf32>
    %117 = tpu.matmul %115, %116, %cst_111 {dimension_numbers = #tpu.dot_dimension_numbers<[1], [0], [0], [1], [0, 0, 1, 1], [], []>} : vector<128x128xf32>, vector<128x128xf32>, vector<128x128xf32> -> vector<128x128xf32>
    %c0_112 = arith.constant 0 : index
    %c0_113 = arith.constant 0 : index
    %118 = vector.load %arg8[%c0_112, %c0_113] : memref<1x128xf32, #tpu.memory_space<vmem>>, vector<1x128xf32>
    %119 = vector.broadcast %118 : vector<1x128xf32> to vector<128x128xf32>
    %120 = arith.addf %117, %119 : vector<128x128xf32>
    %c0_114 = arith.constant 0 : index
    %c1_115 = arith.constant 1 : index
    %c0_116 = arith.constant 0 : index
    %c0_117 = arith.constant 0 : index
    %121 = vector.load %arg2[%c0_114, %c1_115, %c0_116, %c0_117] : memref<1x10x16x128xf32, #tpu.memory_space<vmem>>, vector<1x8x16x128xf32>
    %122 = vector.shape_cast %121 : vector<1x8x16x128xf32> to vector<8x16x128xf32>
    %123 = vector.shape_cast %122 : vector<8x16x128xf32> to vector<128x128xf32>
    %124 = arith.addf %120, %123 : vector<128x128xf32>
    %125 = vector.shape_cast %124 : vector<128x128xf32> to vector<8x16x128xf32>
    %c0_118 = arith.constant 0 : index
    %c0_119 = arith.constant 0 : index
    %c0_120 = arith.constant 0 : index
    %c0_121 = arith.constant 0 : index
    %126 = vector.load %arg9[%c0_118, %c0_119, %c0_120, %c0_121] : memref<1x8x16x128xf32, #tpu.memory_space<vmem>>, vector<1x8x16x128xf32>
    %127 = vector.shape_cast %126 : vector<1x8x16x128xf32> to vector<8x16x128xf32>
    %128 = vector.shape_cast %125 : vector<8x16x128xf32> to vector<1x8x16x128xf32>
    tpu.vector_store %arg9[%c0_118, %c0_119, %c0_120, %c0_121], %128 {strides = array<i32>} : memref<1x8x16x128xf32, #tpu.memory_space<vmem>>, vector<1x8x16x128xf32>,
    return
  }
  func.func @transform_0(%arg0: i32, %arg1: i32) -> (i32, i32, i32, i32) {
    %c2_i32 = arith.constant 2 : i32
    %0 = arith.muli %arg0, %c2_i32 : i32
    %1 = arith.addi %0, %arg1 : i32
    %c0_i32 = arith.constant 0 : i32
    %c0_i32_0 = arith.constant 0 : i32
    %c0_i32_1 = arith.constant 0 : i32
    %c0_i32_2 = arith.constant 0 : i32
    return %1, %c0_i32, %c0_i32_0, %c0_i32_1 : i32, i32, i32, i32
  }
  func.func @transform_1(%arg0: i32, %arg1: i32) -> (i32, i32) {
    %c0_i32 = arith.constant 0 : i32
    %c0_i32_0 = arith.constant 0 : i32
    %c0_i32_1 = arith.constant 0 : i32
    return %c0_i32, %c0_i32_0 : i32, i32
  }
  func.func @transform_2(%arg0: i32, %arg1: i32) -> (i32, i32) {
    %c0_i32 = arith.constant 0 : i32
    %c0_i32_0 = arith.constant 0 : i32
    %c0_i32_1 = arith.constant 0 : i32
    return %c0_i32, %c0_i32_0 : i32, i32
  }
  func.func @transform_3(%arg0: i32, %arg1: i32) -> (i32, i32, i32) {
    %c0_i32 = arith.constant 0 : i32
    %c0_i32_0 = arith.constant 0 : i32
    %c0_i32_1 = arith.constant 0 : i32
    %c0_i32_2 = arith.constant 0 : i32
    return %c0_i32, %c0_i32_0, %c0_i32_1 : i32, i32, i32
  }
  func.func @transform_4(%arg0: i32, %arg1: i32) -> (i32, i32) {
    %c0_i32 = arith.constant 0 : i32
    %c0_i32_0 = arith.constant 0 : i32
    %c0_i32_1 = arith.constant 0 : i32
    return %c0_i32, %c0_i32_0 : i32, i32
  }
  func.func @transform_5(%arg0: i32, %arg1: i32) -> (i32, i32) {
    %c0_i32 = arith.constant 0 : i32
    %c0_i32_0 = arith.constant 0 : i32
    %c0_i32_1 = arith.constant 0 : i32
    return %c0_i32, %c0_i32_0 : i32, i32
  }
  func.func @transform_6(%arg0: i32, %arg1: i32) -> (i32, i32) {
    %c0_i32 = arith.constant 0 : i32
    %c0_i32_0 = arith.constant 0 : i32
    %c0_i32_1 = arith.constant 0 : i32
    return %c0_i32, %c0_i32_0 : i32, i32
  }
  func.func @transform_7(%arg0: i32, %arg1: i32) -> (i32, i32, i32, i32) {
    %c0_i32 = arith.constant 0 : i32
    %c0_i32_0 = arith.constant 0 : i32
    %c0_i32_1 = arith.constant 0 : i32
    return %arg0, %arg1, %c0_i32, %c0_i32_0 : i32, i32, i32, i32
  }
}

</mosaic_0001>

<bundles_post_ra>
// kernel: tpu_custom_call.1
= control target key start
LH: loop header
LB: loop body
LE: loop exit
PB: predicated region body
PF: predicated region fallthrough
CT: control target
= control target key end

     0   :  { %s3154_s0 = inlined_call_operand.hbm [shape: f32[4,10,16,128], index: 0, kind: input, shape index: {}]   ;;  %s3155_s1 = inlined_call_operand.hbm [shape: f32[128,128], index: 1, kind: input, shape index: {}]   ;;  %s3156_s2 = inlined_call_operand.vmem [shape: f32[1,128], index: 2, kind: input, shape index: {}]   ;;  %s3157_s3 = inlined_call_operand.hbm [shape: f32[3,3,128], index: 3, kind: input, shape index: {}]   ;;  %s3158_s4 = inlined_call_operand.vmem [shape: f32[1,128], index: 4, kind: input, shape index: {}]   ;;  %s3159_s5 = inlined_call_operand.hbm [shape: f32[128,128], index: 5, kind: input, shape index: {}]   ;;  %s3160_s6 = inlined_call_operand.vmem [shape: f32[1,128], index: 6, kind: input, shape index: {}]   ;;  %s3161_s7 = inlined_call_operand.hbm [shape: f32[2,16,16,128], index: 7, kind: output, shape index: {}]  }
   0x1   :  { %3173 = sst [smem:[#allocation24_spill]] %s3155_s1 }
   0x2   :  { %3174 = sst [smem:[#allocation25_spill]] %s3157_s3 }
   0x3   :  { %3175 = sst [smem:[#allocation26_spill]] %s3159_s5 }
   0x4   :  { %3176 = sst [smem:[#allocation27_spill]] %s3160_s6 }
   0x5   :  { %3177 = sst [smem:[#allocation28_spill]] %s3161_s7 }
   0x6   :  { %12 = vsyncpa [#allocation5], 0 }
   0x7   :  { %14 = vsyncpa [#allocation5 + $0x1], 0 }
   0x8   :  { %15 = vsyncpa [#allocation8], 0 }
   0x9   :  { %16 = vsyncpa [#allocation11], 0 }
   0xa   :  { %17 = vsyncpa [#allocation6], 0 }
   0xb   :  { %19 = vsyncpa [#allocation6 + $0x1], 0  ;;  %s2519_s24 = smov 0   ;;  %s2521_s25 = smov 0  }
   0xc   :  { %s2523_s26 = smov 0   ;;  %s2525_s27 = smov 0  }
   0xd   :  { %s2527_s28 = smov 0   ;;  %s2529_s29 = smov 0  }
   0xe   :  { %s2531_s30 = smov 0   ;;  %s2533_s8 = smov 0  }
   0xf   :  { %s2535_s9 = smov 0   ;;  %s2537_s10 = smov 0  }
  0x10   :  { %s2539_s11 = smov 0  }
  0x11 LB: > { %3178 = sst [smem:[#allocation17_spill]] %s2423_s24  ;;  %s1853_s12 = sadd.s32 4294967295, %s2463_s11   ;;  %s2463_s11 = sphi %s2539_s11, %s25_s11   ;;  %s2459_s10 = sphi %s2537_s10, %s3215_s10   ;;  %s2455_s9 = sphi %s2535_s9, %s3214_s9   ;;  %s2451_s8 = sphi %s2533_s8, %s3213_s8   ;;  %s2447_s30 = sphi %s2531_s30, %s3205_s30   ;;  %s2443_s29 = sphi %s2529_s29, %s3212_s29   ;;  %s2439_s28 = sphi %s2527_s28, %s3211_s28   ;;  %s2435_s27 = sphi %s2525_s27, %s3210_s27   ;;  %s2431_s26 = sphi %s2523_s26, %s3209_s26   ;;  %s2427_s25 = sphi %s2521_s25, %s3208_s25   ;;  %s2423_s24 = sphi %s2519_s24, %s3207_s24  }
  0x12   : > { %3179 = sst [smem:[#allocation18_spill]] %s2451_s8  ;;  %s1854_s13 = sadd.s32 4294967294, %s2463_s11  }
  0x13   : > { %3180 = sst [smem:[#allocation19_spill]] %s2455_s9  ;;  %p61_p0 = scmp.ne.s32.totalorder %s2439_s28, %s2435_s27 }
  0x14   : > { %3181 = sst [smem:[#allocation20_spill]] %s2463_s11  ;;  %p2575_p1 = scmp.eq.s32.totalorder %s1853_s12, 0 }
  0x15   : > { %p212_p2 = scmp.ne.s32.totalorder %s2431_s26, %s2427_s25  ;;  %p213_p3 = scmp.eq.s32.totalorder %s1853_s12, 3 }
  0x16   : > { %p2583_p4 = por %p2575_p1, %p61_p0  ;;  %p218_p5 = scmp.ne.s32.totalorder %s2427_s25, %s2423_s24 }
  0x17   : > { %p2589_p6 = por %p213_p3, %p212_p2  ;;  %p219_p7 = scmp.eq.s32.totalorder %s1854_s13, 3 }
  0x18   : > { %p1857_p8 = scmp.ge.s32.totalorder %s2463_s11, 1  ;;  %p226_p9 = scmp.lt.s32.totalorder %s2463_s11, 5 }
  0x19   : > { %s3184_s16 = scalar_select %p2589_p6, 1, 0 }
  0x1a   : > { %p2595_p10 = por %p219_p7, %p218_p5  ;;  %p2599_p11 = pnand %p1857_p8, %p226_p9 }
  0x1b   : > { %3185 = sst [smem:[#allocation21_spill]] %s3184_s16  ;;  %s2465_s19 = smov [#allocation7]  }
  0x1c   : > { %s3186_s17 = scalar_select %p2595_p10, 1, 0 }
  0x1d   : > { %s238_s20 = sshll.u32 %s2465_s19, 4  ;;  %p2103_p12 = pneg %p2599_p11  ;;  %s239_s20 = int_to_ptr.vmem [resolvable:$true] %s238_s20 }
  0x1e   : > { %3187 = sst [smem:[#allocation22_spill]] %s3186_s17  ;;  %s2466_s22 = smov [#allocation9]  }
  0x1f   : > { %p2607_p13 = pnand %p2103_p12, %p2575_p1  ;;  %s254_s23 = sshll.u32 %s2466_s22, 4  ;;  %s255_s23 = int_to_ptr.vmem [resolvable:$true] %s254_s23 }
  0x20   : > { %s2240_s27 = scalar_lea.vmem %s239_s20, 2048  ;;  %p2248_p7 = scmp.lt.s32.totalorder %s239_s20, %s239_s20 }
  0x21   : > { %p2231_p0 = pneg %p2607_p13  ;;  %p2241_p2 = scmp.ne.s32.totalorder %s239_s20, %s2240_s27 }
  0x22   : > { %p2249_p8 = scmp.lt.s32.totalorder %s2240_s27, %s2240_s27 }
  0x23   : > { %p2243_p3 = pnand %p2241_p2, %p2231_p0 }
  0x24   : > { %p2250_p9 = por %p2249_p8, %p2248_p7 }
  0x25   : > { %p2244_p5 = pneg %p2243_p3 }
  0x27   : > { %p2251_p12 = pnand %p2250_p9, %p2244_p5 }
  0x29   : > { %2254 = shalt.err (!%p2251_p12)
}
  0x2a   : > { %s3167_s12 = smov 128   ;;  %s3168_s13 = smov 8  }
  0x2b   : > { %s3190_s1 = sld [smem:[#allocation24_spill]]  ;;  %s2266_s17 = scalar_lea.vmem %s255_s23, 192 }
  0x2c   : > { %p2267_p2 = scmp.ne.s32.totalorder %s255_s23, %s2266_s17  ;;  %p2274_p5 = scmp.lt.s32.totalorder %s255_s23, %s255_s23 }
  0x2d   : > { %p2275_p8 = scmp.lt.s32.totalorder %s2266_s17, %s2266_s17 }
  0x2e   : > { %p2269_p3 = pnand %p2267_p2, %p2231_p0 }
  0x2f   : > { %p2276_p9 = por %p2275_p8, %p2274_p5 }
  0x30   : > { %p2270_p7 = pneg %p2269_p3 }
  0x31   : > { %2106 = dma.hbm_to_vmem [thread:$0]  (!%p2607_p13), %s3190_s1, 2048, %s239_s20, [#allocation8], %s3167_s12, %s3167_s12, %s3168_s13  }
  0x32   : > { %p2277_p12 = pnand %p2276_p9, %p2270_p7 }
  0x34   : > { %2280 = shalt.err (!%p2277_p12)
}
  0x35   : > { %s2469_s27 = smov 64   ;;  %s2470_s24 = smov 4  }
  0x36   : > { %s3191_s3 = sld [smem:[#allocation25_spill]]  ;;  %s2471_s20 = smov [#allocation10]  }
  0x37   : > { %s270_s19 = sshll.u32 %s2471_s20, 4  ;;  %s271_s19 = int_to_ptr.vmem [resolvable:$true] %s270_s19 }
  0x38   : > { %s2292_s22 = scalar_lea.vmem %s271_s19, 2048  ;;  %p2300_p7 = scmp.lt.s32.totalorder %s271_s19, %s271_s19 }
  0x39   : > { %p2293_p2 = scmp.ne.s32.totalorder %s271_s19, %s2292_s22  ;;  %p2301_p8 = scmp.lt.s32.totalorder %s2292_s22, %s2292_s22 }
  0x3b   : > { %p2295_p3 = pnand %p2293_p2, %p2231_p0  ;;  %p2302_p9 = por %p2301_p8, %p2300_p7 }
  0x3c   : > { %2109 = dma.hbm_to_vmem [thread:$0]  (!%p2607_p13), %s3191_s3, 192, %s255_s23, [#allocation8], %s2469_s27, %s2469_s27, %s2470_s24  }
  0x3d   : > { %p2296_p5 = pneg %p2295_p3 }
  0x3f   : > { %p2303_p12 = pnand %p2302_p9, %p2296_p5 }
  0x41   : > { %2306 = shalt.err (!%p2303_p12)
}
  0x42   : > { %s3192_s5 = sld [smem:[#allocation26_spill]]  ;;  %s34_s16 = sadd.s32 1, %s2455_s9 }
  0x43   : > { %s37_s17 = sadd.s32 1, %s2459_s10  ;;  %p35_p0 = scmp.ge.s32.totalorder %s34_s16, 2 }
  0x44   : > { %s1855_s21 = sshll.u32 %s2459_s10, 1  ;;  %p55_p2 = scmp.ne.s32.totalorder %s2443_s29, %s2439_s28 }
  0x45   : > { %s42_s23 = sadd.s32 %s2455_s9, %s1855_s21  ;;  %s3217_s16 = smov (%p35_p0, %s34_s16), 0 }
  0x46   : > { %s3219_s17 = smov (!%p35_p0, %s37_s17), %s2459_s10  ;;  %p56_p3 = scmp.eq.s32.totalorder %s2463_s11, 0 }
  0x47   : > { %p39_p5 = scmp.ge.s32.totalorder %s3219_s17, 2  ;;  %s48_s27 = sadd.s32 1, %s2443_s29 }
  0x48   : > { %2112 = dma.hbm_to_vmem [thread:$0]  (!%p2607_p13), %s3192_s5, 2048, %s271_s19, [#allocation11], %s3167_s12, %s3167_s12, %s3168_s13  }
  0x49   : > { %p2654_p13 = por %p56_p3, %p55_p2  ;;  %s198_s19 = ssub.s32 %s2455_s9, %s3217_s16 }
  0x4a   : > { %s3221_s17 = smov (%p39_p5, %s3219_s17), 0  ;;  %s202_s22 = sadd.s32 1, %s2431_s26 }
  0x4b   : > { %3194 = sst [smem:[#allocation23_spill]] %s3221_s17  ;;  %p2124_p7 = scmp.lt.s32.totalorder %s2463_s11, 4 }
  0x4c   : > { %s1856_s7 = sshll.u32 %s3221_s17, 1  ;;  %s197_s24 = ssub.s32 %s2459_s10, %s3221_s17 }
  0x4d   : > { %s44_s21 = sadd.s32 %s1856_s7, %s3217_s16  ;;  %s199_s12 = sor.u32 %s198_s19, %s197_s24 }
  0x4e   : > { %s45_s13 = ssub.s32 %s42_s23, %s44_s21  ;;  %p200_p8 = scmp.eq.s32.totalorder %s199_s12, 0 }
  0x4f   : > { %p46_p9 = scmp.eq.s32.totalorder %s45_s13, 0  ;;  %s287_s1 = sand.u32 1, %s2443_s29  }
  0x50   : > { %s2670_s3 = scalar_select %p200_p8, %s2431_s26, %s202_s22  }
  0x51   : > { %s2673_s5 = scalar_select %p46_p9, %s2443_s29, %s48_s27  }
  0x52   : > { %s2084_s8 = smul.u32 160, %s287_s1  ;;  %p2677_p12 = pnand %p2124_p7, %p2654_p13 }
  0x53   : > { %s2085_s11 = smul.u32 2560, %s42_s23  ;;  %s288_s13 = scalar_lea.sflag [#allocation5], %s287_s1 }
  0x54   : > { %s291_s7 = scalar_lea.vmem [#allocation4], %s2084_s8  ;;  %p2309_p0 = pneg %p2677_p12 }
  0x55   : > { %s299_s19 = scalar_lea.hbm %s3154_s0, %s2085_s11  ;;  %s300_s12 = sshll.u32 %s291_s7, 4  ;;  %s301_s12 = int_to_ptr.vmem [resolvable:$true] %s300_s12 }
  0x56   : > { %s2320_s27 = scalar_lea.vmem %s301_s12, 2560  ;;  %s2472_s20 = smov [#allocation4]  }
  0x57   : > { %p2321_p2 = scmp.ne.s32.totalorder %s301_s12, %s2320_s27  ;;  %s2325_s22 = sshll.u32 %s2472_s20, 4  ;;  %s2326_s22 = int_to_ptr.vmem [resolvable:$false] %s2325_s22 }
  0x58   : > { %s2327_s24 = scalar_lea.vmem %s2326_s22, 5120  ;;  %p2328_p13 = scmp.lt.s32.totalorder %s301_s12, %s2326_s22 }
  0x59   : > { %p2323_p3 = pnand %p2321_p2, %p2309_p0  ;;  %p2329_p7 = scmp.lt.s32.totalorder %s2327_s24, %s2320_s27 }
  0x5b   : > { %p2324_p5 = pneg %p2323_p3  ;;  %p2330_p8 = por %p2329_p7, %p2328_p13 }
  0x5d   : > { %p2331_p9 = pnand %p2330_p8, %p2324_p5 }
  0x5f   : > { %2334 = shalt.err (!%p2331_p9)
}
  0x60   : > { %s3196_s6 = smov 8   ;;  %s3197_s8 = smov 128  }
  0x61   : > { %2116 = dma.hbm_to_vmem [thread:$0]  (!%p2677_p12), %s299_s19, 2560, %s301_s12, %s288_s13, %s3197_s8, %s3197_s8, %s3196_s6  }
  0x62   : > { %312 = sbr.rel (%p2599_p11) target bundleno = 705 (0x2c1), region = 48  ;;  %s314_s1 = sand.u32 (!%p2599_p11), 1, %s2439_s28  }
  0x63   : > { %s2086_s11 = smul.u32 (!%p2599_p11), 160, %s314_s1  ;;  %s315_s17 = scalar_lea.sflag (!%p2599_p11), [#allocation5], %s314_s1 }
  0x65   : > { %s2694_s23 = scalar_lea.vmem (!%p2599_p11), [#allocation4], %s2086_s11 }
  0x67   : > { %2406 = dma.done.wait (%p2583_p4), %s315_s17, 2560  }
  0x68   : > { %2408 = vsyncadd (%p2583_p4), %s315_s17, 4294964736 }
  0x69   : > { %2410 = dma.done.wait (%p2575_p1), [#allocation8], 2240  }
  0x6a   : > { %2412 = vsyncadd (%p2575_p1), [#allocation8], 4294965056 }
  0x6b   : > { %2414 = dma.done.wait (%p2575_p1), [#allocation11], 2048  }
  0x6c   : > { %2416 = vsyncadd (%p2575_p1), [#allocation11], 4294965248  ;;  %s358_s9 = sand.u32 1, %s2427_s25   ;;  %v2473_v0 = vmov 0.0   ;;  %v399_v1 = vld [vmem:[#allocation7 + $0x78] sm:$0xff]  ;;  %v398_v2 = vld [vmem:[#allocation7 + $0x70] sm:$0xff] }
  0x6d   : > { %632 = vst [vmem:[#allocation2 + $0x7] sm:$0x1] %v2473_v0  ;;  %633 = vst [vmem:[#allocation2 + $0x27] sm:$0x1] %v2473_v0  ;;  %s2711_s14 = sshll.u32 %s358_s9, 7  ;;  %1966 = vmatprep.subr.mxu0 %v399_v1  ;;  %v397_v3 = vld [vmem:[#allocation7 + $0x68] sm:$0xff] }
  0x6e   : > { %634 = vst [vmem:[#allocation2 + $0x47] sm:$0x1] %v2473_v0  ;;  %635 = vst [vmem:[#allocation2 + $0x67] sm:$0x1] %v2473_v0  ;;  %1967 = vmatpush3.msra.mxu0 %v399_v1  ;;  %v396_v4 = vld [vmem:[#allocation7 + $0x60] sm:$0xff]  ;;  %v395_v6 = vld [vmem:[#allocation7 + $0x58] sm:$0xff] }
  0x6f   : > { %636 = vst [vmem:[#allocation2 + $0x87] sm:$0x1] %v2473_v0  ;;  %637 = vst [vmem:[#allocation2 + $0xa7] sm:$0x1] %v2473_v0  ;;  %1968 = vmatprep.subr.mxu0 %v398_v2  ;;  %v364_v5 = vld [vmem:[%s2694_s23] sm:$0xff]  ;;  %v394_v7 = vld [vmem:[#allocation7 + $0x50] sm:$0xff] }
  0x70   : > { %638 = vst [vmem:[#allocation2 + $0xc7] sm:$0x1] %v2473_v0  ;;  %639 = vst [vmem:[#allocation2 + $0xe7] sm:$0x1] %v2473_v0  ;;  %1969 = vmatpush3.msra.mxu0 %v398_v2  ;;  %1998 = vmatprep.mubr.f32.mxu0 %v364_v5  ;;  %v393_v8 = vld [vmem:[#allocation7 + $0x48] sm:$0xff]  ;;  %v392_v9 = vld [vmem:[#allocation7 + $0x40] sm:$0xff] }
  0x71   : > { %640 = vst [vmem:[#allocation2 + $0x107] sm:$0x1] %v2473_v0  ;;  %641 = vst [vmem:[#allocation2 + $0x127] sm:$0x1] %v2473_v0  ;;  %1970 = vmatprep.subr.mxu0 %v397_v3  ;;  %v391_v10 = vld [vmem:[#allocation7 + $0x38] sm:$0xff]  ;;  %v390_v11 = vld [vmem:[#allocation7 + $0x30] sm:$0xff] }
  0x72   : > { %642 = vst [vmem:[#allocation2 + $0x18] sm:$0x1] %v2473_v0  ;;  %643 = vst [vmem:[#allocation2 + $0x38] sm:$0x1] %v2473_v0  ;;  %1971 = vmatpush3.msra.mxu0 %v397_v3  ;;  %v389_v12 = vld [vmem:[#allocation7 + $0x28] sm:$0xff]  ;;  %v388_v13 = vld [vmem:[#allocation7 + $0x20] sm:$0xff] }
  0x73   : > { %644 = vst [vmem:[#allocation2 + $0x58] sm:$0x1] %v2473_v0  ;;  %645 = vst [vmem:[#allocation2 + $0x78] sm:$0x1] %v2473_v0  ;;  %1972 = vmatprep.subr.mxu0 %v396_v4  ;;  %v387_v14 = vld [vmem:[#allocation7 + $0x18] sm:$0xff]  ;;  %v386_v15 = vld [vmem:[#allocation7 + $0x10] sm:$0xff] }
  0x74   : > { %646 = vst [vmem:[#allocation2 + $0x98] sm:$0x1] %v2473_v0  ;;  %647 = vst [vmem:[#allocation2 + $0xb8] sm:$0x1] %v2473_v0  ;;  %1973 = vmatpush3.msra.mxu0 %v396_v4  ;;  %v385_v16 = vld [vmem:[#allocation7 + $0x8] sm:$0xff]  ;;  %v384_v17 = vld [vmem:[#allocation7] sm:$0xff] }
  0x75   : > { %648 = vst [vmem:[#allocation2 + $0xd8] sm:$0x1] %v2473_v0  ;;  %649 = vst [vmem:[#allocation2 + $0xf8] sm:$0x1] %v2473_v0  ;;  %1974 = vmatprep.subr.mxu0 %v395_v6  ;;  %v365_v18 = vld [vmem:[%s2694_s23 + $0x8] sm:$0xff]  ;;  %v366_v19 = vld [vmem:[%s2694_s23 + $0x10] sm:$0xff] }
  0x76   : > { %650 = vst [vmem:[#allocation2 + $0x118] sm:$0x1] %v2473_v0  ;;  %651 = vst [vmem:[#allocation2 + $0x138] sm:$0x1] %v2473_v0  ;;  %1975 = vmatpush3.msra.mxu0 %v395_v6  ;;  %v367_v20 = vld [vmem:[%s2694_s23 + $0x18] sm:$0xff]  ;;  %v368_v21 = vld [vmem:[%s2694_s23 + $0x20] sm:$0xff] }
  0x77   : > { %1976 = vmatprep.subr.mxu0 %v394_v7  ;;  %v369_v22 = vld [vmem:[%s2694_s23 + $0x28] sm:$0xff]  ;;  %v370_v23 = vld [vmem:[%s2694_s23 + $0x30] sm:$0xff]  ;;  %v371_v24 = vld [vmem:[%s2694_s23 + $0x38] sm:$0xff]  ;;  %s2759_s21 = scalar_lea.vmem [#allocation12], %s2711_s14  ;;  %p1870_p1 = scmp.ne.s32.totalorder %s2447_s30, 0 }
  0x78   : > { %1977 = vmatpush3.msra.mxu0 %v394_v7  ;;  %v372_v25 = vld [vmem:[%s2694_s23 + $0x40] sm:$0xff]  ;;  %v373_v26 = vld [vmem:[%s2694_s23 + $0x48] sm:$0xff]  ;;  %v374_v27 = vld [vmem:[%s2694_s23 + $0x50] sm:$0xff] }
  0x79   : > { %1978 = vmatprep.subr.mxu0 %v393_v8  ;;  %v375_v28 = vld [vmem:[%s2694_s23 + $0x58] sm:$0xff]  ;;  %v376_v29 = vld [vmem:[%s2694_s23 + $0x60] sm:$0xff]  ;;  %v377_v30 = vld [vmem:[%s2694_s23 + $0x68] sm:$0xff] }
  0x7a   : > { %1979 = vmatpush3.msra.mxu0 %v393_v8  ;;  %v378_v31 = vld [vmem:[%s2694_s23 + $0x70] sm:$0xff]  ;;  %v379_v32 = vld [vmem:[%s2694_s23 + $0x78] sm:$0xff]  ;;  %v380_v33 = vld [vmem:[%s2694_s23 + $0x80] sm:$0xff] }
  0x7b   : > { %1980 = vmatprep.subr.mxu0 %v392_v9  ;;  %v381_v34 = vld [vmem:[%s2694_s23 + $0x88] sm:$0xff]  ;;  %v382_v35 = vld [vmem:[%s2694_s23 + $0x90] sm:$0xff]  ;;  %v383_v36 = vld [vmem:[%s2694_s23 + $0x98] sm:$0xff] }
  0x7c   : > { %1981 = vmatpush3.msra.mxu0 %v392_v9  ;;  %v2736_v37 = vld [vmem:[%s3156_s2] ss:$0 sm:$0xff] }
  0x7d   : > { %1982 = vmatprep.subr.mxu0 %v391_v10 }
  0x7e   : > { %1983 = vmatpush3.msra.mxu0 %v391_v10 }
  0x7f   : > { %1984 = vmatprep.subr.mxu0 %v390_v11 }
  0x80   : > { %1985 = vmatpush3.msra.mxu0 %v390_v11 }
  0x81   : > { %1986 = vmatprep.subr.mxu0 %v389_v12 }
  0x82   : > { %1987 = vmatpush3.msra.mxu0 %v389_v12 }
  0x83   : > { %1988 = vmatprep.subr.mxu0 %v388_v13 }
  0x84   : > { %1989 = vmatpush3.msra.mxu0 %v388_v13 }
  0x85   : > { %1990 = vmatprep.subr.mxu0 %v387_v14 }
  0x86   : > { %1991 = vmatpush3.msra.mxu0 %v387_v14 }
  0x87   : > { %1992 = vmatprep.subr.mxu0 %v386_v15 }
  0x88   : > { %1993 = vmatpush3.msra.mxu0 %v386_v15 }
  0x89   : > { %1994 = vmatprep.subr.mxu0 %v385_v16 }
  0x8a   : > { %1995 = vmatpush3.msra.mxu0 %v385_v16 }
  0x8b   : > { %1996 = vmatprep.subr.mxu0 %v384_v17 }
  0x8c   : > { %1997 = vmatpush3.msra.mxu0 %v384_v17 }
  0x8d   : > { %1999 = vmatmul.mubr.f32.vlgmr.msra.gmra.mxu0 %v365_v18 }
  0x8e   : > { %2001 = vmatprep.mubr.f32.mxu0 %v366_v19 }
  0x91   : > { %2002 = vmatmul.mubr.f32.gmra.mxu0 %v367_v20 }
  0x92   : > { %2004 = vmatprep.mubr.f32.mxu0 %v368_v21 }
  0x95   : > { %2005 = vmatmul.mubr.f32.gmra.mxu0 %v369_v22 }
  0x96   : > { %2007 = vmatprep.mubr.f32.mxu0 %v370_v23 }
  0x99   : > { %2008 = vmatmul.mubr.f32.gmra.mxu0 %v371_v24 }
  0x9a   : > { %2010 = vmatprep.mubr.f32.mxu0 %v372_v25 }
  0x9d   : > { %2011 = vmatmul.mubr.f32.gmra.mxu0 %v373_v26 }
  0x9e   : > { %2013 = vmatprep.mubr.f32.mxu0 %v374_v27 }
  0xa1   : > { %2014 = vmatmul.mubr.f32.gmra.mxu0 %v375_v28 }
  0xa2   : > { %2016 = vmatprep.mubr.f32.mxu0 %v376_v29 }
  0xa5   : > { %2017 = vmatmul.mubr.f32.gmra.mxu0 %v377_v30 }
  0xa6   : > { %2019 = vmatprep.mubr.f32.mxu0 %v378_v31 }
  0xa9   : > { %2020 = vmatmul.mubr.f32.gmra.mxu0 %v379_v32 }
  0xaa   : > { %2022 = vmatprep.mubr.f32.mxu0 %v380_v33 }
  0xad   : > { %2023 = vmatmul.mubr.f32.gmra.mxu0 %v381_v34 }
  0xae   : > { %2025 = vmatprep.mubr.f32.mxu0 %v382_v35 }
  0xb1   : > { %2026 = vmatmul.mubr.f32.gmra.mxu0 %v383_v36 }
 0x14d   : > { %v2000_v38 = vpop.f32.mrf.mxu0 }
 0x14e   : > { %v479_v39 = vadd.f32 %v2000_v38, %v2736_v37 }
 0x14f   : > { %v473_v40 = vpop.f32.mrf.mxu0 }
 0x150   : > { %v573_v41 = vmax.f32 %v479_v39, 0.0  ;;  %v474_v42 = vadd.f32 %v2736_v37, %v473_v40 }
 0x151   : > { %v2003_v43 = vpop.f32.mrf.mxu0 }
 0x152   : > { %v593_v44 = vmin.f32 %v573_v41, 6.0  ;;  %v572_v45 = vmax.f32 %v474_v42, 0.0  ;;  %v489_v46 = vadd.f32 %v2003_v43, %v2736_v37 }
 0x153   : > { %v483_v47 = vpop.f32.mrf.mxu0 }
 0x154   : > { %613 = vst [vmem:[#allocation2 + $0x10] sm:$0xff] %v593_v44  ;;  %v592_v48 = vmin.f32 %v572_v45, 6.0  ;;  %v575_v49 = vmax.f32 %v489_v46, 0.0  ;;  %v484_v50 = vadd.f32 %v2736_v37, %v483_v47 }
 0x155   : > { %v2006_v51 = vpop.f32.mrf.mxu0 }
 0x156   : > { %612 = vst [vmem:[#allocation2 + $0x8] sm:$0xff] %v592_v48  ;;  %v595_v52 = vmin.f32 %v575_v49, 6.0  ;;  %v574_v53 = vmax.f32 %v484_v50, 0.0  ;;  %v499_v54 = vadd.f32 %v2006_v51, %v2736_v37 }
 0x157   : > { %v493_v55 = vpop.f32.mrf.mxu0 }
 0x158   : > { %615 = vst [vmem:[#allocation2 + $0x30] sm:$0xff] %v595_v52  ;;  %v594_v56 = vmin.f32 %v574_v53, 6.0  ;;  %v577_v57 = vmax.f32 %v499_v54, 0.0  ;;  %v494_v58 = vadd.f32 %v2736_v37, %v493_v55 }
 0x159   : > { %v2009_v59 = vpop.f32.mrf.mxu0 }
 0x15a   : > { %614 = vst [vmem:[#allocation2 + $0x28] sm:$0xff] %v594_v56  ;;  %v597_v60 = vmin.f32 %v577_v57, 6.0  ;;  %v576_v61 = vmax.f32 %v494_v58, 0.0  ;;  %v509_v62 = vadd.f32 %v2009_v59, %v2736_v37 }
 0x15b   : > { %v503_v63 = vpop.f32.mrf.mxu0 }
 0x15c   : > { %617 = vst [vmem:[#allocation2 + $0x50] sm:$0xff] %v597_v60  ;;  %v596_v0 = vmin.f32 %v576_v61, 6.0  ;;  %v579_v1 = vmax.f32 %v509_v62, 0.0  ;;  %v504_v2 = vadd.f32 %v2736_v37, %v503_v63 }
 0x15d   : > { %v2012_v3 = vpop.f32.mrf.mxu0 }
 0x15e   : > { %616 = vst [vmem:[#allocation2 + $0x48] sm:$0xff] %v596_v0  ;;  %v599_v4 = vmin.f32 %v579_v1, 6.0  ;;  %v578_v5 = vmax.f32 %v504_v2, 0.0  ;;  %v519_v6 = vadd.f32 %v2012_v3, %v2736_v37 }
 0x15f   : > { %v513_v7 = vpop.f32.mrf.mxu0 }
 0x160   : > { %619 = vst [vmem:[#allocation2 + $0x70] sm:$0xff] %v599_v4  ;;  %v598_v8 = vmin.f32 %v578_v5, 6.0  ;;  %v581_v9 = vmax.f32 %v519_v6, 0.0  ;;  %v514_v10 = vadd.f32 %v2736_v37, %v513_v7 }
 0x161   : > { %v2015_v11 = vpop.f32.mrf.mxu0 }
 0x162   : > { %618 = vst [vmem:[#allocation2 + $0x68] sm:$0xff] %v598_v8  ;;  %v601_v12 = vmin.f32 %v581_v9, 6.0  ;;  %v580_v13 = vmax.f32 %v514_v10, 0.0  ;;  %v529_v14 = vadd.f32 %v2015_v11, %v2736_v37 }
 0x163   : > { %v523_v15 = vpop.f32.mrf.mxu0 }
 0x164   : > { %621 = vst [vmem:[#allocation2 + $0x90] sm:$0xff] %v601_v12  ;;  %v600_v16 = vmin.f32 %v580_v13, 6.0  ;;  %v583_v17 = vmax.f32 %v529_v14, 0.0  ;;  %v524_v18 = vadd.f32 %v2736_v37, %v523_v15 }
 0x165   : > { %v2018_v19 = vpop.f32.mrf.mxu0 }
 0x166   : > { %620 = vst [vmem:[#allocation2 + $0x88] sm:$0xff] %v600_v16  ;;  %v603_v20 = vmin.f32 %v583_v17, 6.0  ;;  %v582_v21 = vmax.f32 %v524_v18, 0.0  ;;  %v539_v22 = vadd.f32 %v2018_v19, %v2736_v37 }
 0x167   : > { %v533_v23 = vpop.f32.mrf.mxu0 }
 0x168   : > { %623 = vst [vmem:[#allocation2 + $0xb0] sm:$0xff] %v603_v20  ;;  %v602_v24 = vmin.f32 %v582_v21, 6.0  ;;  %v585_v25 = vmax.f32 %v539_v22, 0.0  ;;  %v534_v26 = vadd.f32 %v2736_v37, %v533_v23 }
 0x169   : > { %v2021_v27 = vpop.f32.mrf.mxu0 }
 0x16a   : > { %622 = vst [vmem:[#allocation2 + $0xa8] sm:$0xff] %v602_v24  ;;  %v605_v28 = vmin.f32 %v585_v25, 6.0  ;;  %v584_v29 = vmax.f32 %v534_v26, 0.0  ;;  %v549_v30 = vadd.f32 %v2021_v27, %v2736_v37 }
 0x16b   : > { %v543_v31 = vpop.f32.mrf.mxu0 }
 0x16c   : > { %625 = vst [vmem:[#allocation2 + $0xd0] sm:$0xff] %v605_v28  ;;  %v604_v32 = vmin.f32 %v584_v29, 6.0  ;;  %v587_v33 = vmax.f32 %v549_v30, 0.0  ;;  %v544_v34 = vadd.f32 %v2736_v37, %v543_v31 }
 0x16d   : > { %v2024_v35 = vpop.f32.mrf.mxu0 }
 0x16e   : > { %624 = vst [vmem:[#allocation2 + $0xc8] sm:$0xff] %v604_v32  ;;  %v607_v36 = vmin.f32 %v587_v33, 6.0  ;;  %v586_v38 = vmax.f32 %v544_v34, 0.0  ;;  %v559_v39 = vadd.f32 %v2024_v35, %v2736_v37 }
 0x16f   : > { %v553_v40 = vpop.f32.mrf.mxu0 }
 0x170   : > { %627 = vst [vmem:[#allocation2 + $0xf0] sm:$0xff] %v607_v36  ;;  %v606_v41 = vmin.f32 %v586_v38, 6.0  ;;  %v589_v42 = vmax.f32 %v559_v39, 0.0  ;;  %v554_v43 = vadd.f32 %v2736_v37, %v553_v40 }
 0x171   : > { %v2027_v44 = vpop.f32.mrf.mxu0 }
 0x172   : > { %626 = vst [vmem:[#allocation2 + $0xe8] sm:$0xff] %v606_v41  ;;  %v609_v45 = vmin.f32 %v589_v42, 6.0  ;;  %v588_v46 = vmax.f32 %v554_v43, 0.0  ;;  %v569_v47 = vadd.f32 %v2027_v44, %v2736_v37 }
 0x173   : > { %v563_v48 = vpop.f32.mrf.mxu0 }
 0x174   : > { %629 = vst [vmem:[#allocation2 + $0x110] sm:$0xff] %v609_v45  ;;  %v608_v49 = vmin.f32 %v588_v46, 6.0  ;;  %v591_v50 = vmax.f32 %v569_v47, 0.0  ;;  %v564_v51 = vadd.f32 %v2736_v37, %v563_v48 }
 0x176   : > { %628 = vst [vmem:[#allocation2 + $0x108] sm:$0xff] %v608_v49  ;;  %v611_v52 = vmin.f32 %v591_v50, 6.0  ;;  %v590_v53 = vmax.f32 %v564_v51, 0.0  ;;  %655 = sbr.rel (%p1870_p1) target bundleno = 382 (0x17e), region = 68 }
 0x178   : > { %631 = vst [vmem:[#allocation2 + $0x130] sm:$0xff] %v611_v52  ;;  %v610_v54 = vmin.f32 %v590_v53, 6.0 }
 0x17a   : > { %630 = vst [vmem:[#allocation2 + $0x128] sm:$0xff] %v610_v54 }
 0x17b   : > { %v2474_v55 = vmov 0.0  }
 0x17c   : > { %656 = vst [vmem:[#allocation2] sm:$0xff] %v2474_v55  ;;  %657 = vst [vmem:[#allocation2 + $0x8] sm:$0xff] %v2474_v55 }
 0x17d   : > { %658 = vst [vmem:[#allocation2 + $0x10] sm:$0xff] %v2474_v55  ;;  %659 = vst [vmem:[#allocation2 + $0x18] sm:$0x1] %v2474_v55 }
 0x17e PF: > { %p1871_p4 = scmp.ne.s32.totalorder %s2447_s30, 1 }
 0x180   : > { %663 = sbr.rel (%p1871_p4) target bundleno = 392 (0x188), region = 72 }
 0x185   : > { %v2475_v37 = vmov 0.0  }
 0x186   : > { %665 = vst [vmem:[#allocation2 + $0x120] sm:$0xff] %v2475_v37  ;;  %666 = vst [vmem:[#allocation2 + $0x128] sm:$0xff] %v2475_v37 }
 0x187   : > { %667 = vst [vmem:[#allocation2 + $0x130] sm:$0xff] %v2475_v37  ;;  %668 = vst [vmem:[#allocation2 + $0x138] sm:$0x1] %v2475_v37 }
 0x188 PF: > { %v1516_v56 = vld [vmem:[#allocation10 + $0x78] sm:$0xff]  ;;  %v1515_v57 = vld [vmem:[#allocation10 + $0x70] sm:$0xff]  ;;  %v727_v58 = vlaneseq  ;;  %v1514_v59 = vld [vmem:[#allocation10 + $0x68] sm:$0xff]  ;;  %s3198_s27 = sld [smem:[#allocation27_spill]]  ;;  %s1897_s22 = sshll.u32 %s2447_s30, 4 }
 0x189   : > { %2028 = vmatprep.subr.mxu1 %v1516_v56  ;;  %v1513_v61 = vld [vmem:[#allocation10 + $0x60] sm:$0xff]  ;;  %v1512_v1 = vld [vmem:[#allocation10 + $0x58] sm:$0xff]  ;;  %v669_v2 = vld [vmem:[#allocation9] sm:$0x7]  ;;  %s3199_s20 = sld [smem:[#allocation18_spill]]  ;;  %s1735_s11 = sshll.u32 %s2759_s21, 4  ;;  %s3088_s11 = int_to_ptr.vmem [resolvable:$true] %s1735_s11 }
 0x18a   : > { %2029 = vmatpush3.msra.mxu1 %v1516_v56  ;;  %v728_v60 = vshrl.u32 %v727_v58, 7  ;;  %v670_v3 = vld [vmem:[#allocation9 + $0x4] sm:$0x7]  ;;  %v671_v4 = vld [vmem:[#allocation9 + $0x8] sm:$0x7]  ;;  %v1511_v17 = vld [vmem:[#allocation10 + $0x50] sm:$0xff] }
 0x18b   : > { %2030 = vmatprep.subr.mxu1 %v1515_v57  ;;  %v2766_v5 = vld [vmem:[%s3158_s4] ss:$0 sm:$0xff]  ;;  %v695_v6 = vld [vmem:[#allocation2 + $0x7] sm:$0xff]  ;;  %v1510_v18 = vld [vmem:[#allocation10 + $0x48] sm:$0xff]  ;;  %s3201_s14 = sld [smem:[#allocation28_spill]]  ;;  %s3094_s18 = scalar_lea.sflag [#allocation6], %s358_s9 }
 0x18c   : > { %2031 = vmatpush3.msra.mxu1 %v1515_v57  ;;  %v729_v62 = vsub.s32 0, %v728_v60  ;;  %v813_v63 = vsub.s32 1, %v728_v60  ;;  %v897_v0 = vsub.s32 2, %v728_v60  ;;  %v779_v11 = vld [vmem:[#allocation2 + $0x8] sm:$0xff]  ;;  %v780_v31 = vld [vmem:[#allocation2 + $0x10] sm:$0xff]  ;;  %s2476_s19 = smov [#allocation12]  }
 0x18d   : > { %2032 = vmatprep.subr.mxu1 %v1514_v59  ;;  %v863_v12 = vld [vmem:[#allocation2 + $0x9] sm:$0xff]  ;;  %v864_v32 = vld [vmem:[#allocation2 + $0x11] sm:$0xff]  ;;  %s2339_s7 = sshll.u32 %s2476_s19, 4  ;;  %s2340_s7 = int_to_ptr.vmem [resolvable:$false] %s2339_s7 }
 0x18e   : > { %2033 = vmatpush3.msra.mxu1 %v1514_v59  ;;  %v2768_v7 = vrot.slane %v669_v2, %v729_v62  ;;  %v2770_v8 = vrot.slane %v669_v2, %v813_v63  ;;  %v2772_v9 = vrot.slane %v669_v2, %v897_v0  ;;  %v2774_v10 = vrot.slane %v670_v3, %v729_v62  ;;  %v948_v13 = vld [vmem:[#allocation2 + $0x27] sm:$0xff]  ;;  %v696_v26 = vld [vmem:[#allocation2 + $0xf] sm:$0xff]  ;;  %s2341_s12 = scalar_lea.vmem %s2340_s7, 4096  ;;  %p2342_p2 = scmp.lt.s32.totalorder %s3088_s11, %s2340_s7 }
 0x18f   : > { %2034 = vmatprep.subr.mxu1 %v1513_v61  ;;  %v2776_v14 = vrot.slane %v670_v3, %v813_v63  ;;  %v2778_v15 = vrot.slane %v670_v3, %v897_v0  ;;  %v2780_v16 = vrot.slane %v671_v4, %v729_v62  ;;  %v2784_v21 = vrot.slane %v671_v4, %v813_v63  ;;  %v1032_v23 = vld [vmem:[#allocation2 + $0x28] sm:$0xff]  ;;  %v1033_v47 = vld [vmem:[#allocation2 + $0x30] sm:$0xff]  ;;  %s1893_s24 = sshll.u32 %s3199_s20, 5 }
 0x190   : > { %2035 = vmatpush3.msra.mxu1 %v1513_v61  ;;  %v731_v19 = vmul.f32 %v2768_v7, %v695_v6  ;;  %v815_v20 = vmul.f32 %v2770_v8, %v779_v11  ;;  %v899_v22 = vmul.f32 %v2772_v9, %v863_v12  ;;  %v1116_v24 = vld [vmem:[#allocation2 + $0x29] sm:$0xff]  ;;  %v2787_v25 = vrot.slane %v671_v4, %v897_v0  ;;  %v1117_v52 = vld [vmem:[#allocation2 + $0x31] sm:$0xff]  ;;  %v1507_v0 = vld [vmem:[#allocation10 + $0x30] sm:$0xff]  ;;  %s1732_s6 = sadd.s32 %s1897_s22, %s1893_s24 }
 0x191   : > { %2036 = vmatprep.subr.mxu1 %v1512_v1  ;;  %v984_v28 = vmul.f32 %v2774_v10, %v948_v13  ;;  %v2791_v29 = vld [vmem:[#allocation2 + $0x47] sm:$0xff]  ;;  %v732_v30 = vmul.f32 %v2768_v7, %v696_v26  ;;  %v733_v33 = vmul.f32 %v948_v13, %v2768_v7  ;;  %v1068_v35 = vmul.f32 %v2776_v14, %v1032_v23  ;;  %v949_v46 = vld [vmem:[#allocation2 + $0x2f] sm:$0xff]  ;;  %s1894_s1 = sshll.u32 %s1732_s6, 7 }
 0x192   : > { %2037 = vmatpush3.msra.mxu1 %v1512_v1  ;;  %v747_v27 = vadd.f32 %v2766_v5, %v731_v19  ;;  %v1509_v34 = vld [vmem:[#allocation10 + $0x40] sm:$0xff]  ;;  %v1152_v36 = vmul.f32 %v2778_v15, %v1116_v24  ;;  %v2799_v38 = vmul.f32 %v2780_v16, %v2791_v29  ;;  %v816_v40 = vmul.f32 %v2770_v8, %v780_v31  ;;  %v1508_v48 = vld [vmem:[#allocation10 + $0x38] sm:$0xff]  ;;  %s3086_s15 = scalar_lea.hbm %s3201_s14, %s1894_s1 }
 0x193   : > { %2038 = vmatprep.subr.mxu1 %v1511_v17  ;;  %v2801_v39 = vld [vmem:[#allocation2 + $0x48] sm:$0xff]  ;;  %v748_v44 = vadd.f32 %v2766_v5, %v732_v30  ;;  %v900_v45 = vmul.f32 %v2772_v9, %v864_v32  ;;  %v985_v50 = vmul.f32 %v2774_v10, %v949_v46  ;;  %v1069_v51 = vmul.f32 %v2776_v14, %v1033_v47  ;;  %v2821_v56 = vld [vmem:[#allocation2 + $0x50] sm:$0xff] }
 0x194   : > { %2039 = vmatpush3.msra.mxu1 %v1511_v17  ;;  %v831_v41 = vadd.f32 %v815_v20, %v747_v27  ;;  %v2806_v42 = vmul.f32 %v2784_v21, %v2801_v39  ;;  %v2808_v43 = vld [vmem:[#allocation2 + $0x49] sm:$0xff]  ;;  %v749_v53 = vadd.f32 %v2766_v5, %v733_v33  ;;  %v2823_v57 = vld [vmem:[#allocation2 + $0x51] sm:$0xff]  ;;  %v817_v58 = vmul.f32 %v1032_v23, %v2770_v8 }
 0x195   : > { %2040 = vmatprep.subr.mxu1 %v1510_v18  ;;  %v2814_v49 = vmul.f32 %v2787_v25, %v2808_v43  ;;  %v832_v55 = vadd.f32 %v816_v40, %v748_v44  ;;  %v2819_v37 = vld [vmem:[#allocation2 + $0x4f] sm:$0xff]  ;;  %v901_v59 = vmul.f32 %v1116_v24, %v2772_v9  ;;  %v1153_v60 = vmul.f32 %v2778_v15, %v1117_v52  ;;  %v2844_v12 = vld [vmem:[#allocation2 + $0x67] sm:$0xff] }
 0x196   : > { %2041 = vmatpush3.msra.mxu1 %v1510_v18  ;;  %v915_v54 = vadd.f32 %v899_v22, %v831_v41  ;;  %v1238_v61 = vmul.f32 %v2780_v16, %v2819_v37  ;;  %v2832_v62 = vmul.f32 %v2784_v21, %v2821_v56  ;;  %v2836_v63 = vmul.f32 %v2787_v25, %v2823_v57  ;;  %v1506_v18 = vld [vmem:[#allocation10 + $0x28] sm:$0xff]  ;;  %v2850_v24 = vld [vmem:[#allocation2 + $0x68] sm:$0xff] }
 0x197   : > { %2042 = vmatprep.subr.mxu1 %v1509_v34  ;;  %v916_v2 = vadd.f32 %v900_v45, %v832_v55  ;;  %v833_v3 = vadd.f32 %v817_v58, %v749_v53  ;;  %v986_v4 = vmul.f32 %v2791_v29, %v2774_v10  ;;  %v1070_v6 = vmul.f32 %v2801_v39, %v2776_v14  ;;  %v2852_v26 = vld [vmem:[#allocation2 + $0x69] sm:$0xff] }
 0x198   : > { %2043 = vmatpush3.msra.mxu1 %v1509_v34  ;;  %v1000_v1 = vadd.f32 %v984_v28, %v915_v54  ;;  %v1154_v11 = vmul.f32 %v2808_v43, %v2778_v15  ;;  %v734_v13 = vmul.f32 %v949_v46, %v2768_v7  ;;  %v818_v17 = vmul.f32 %v1033_v47, %v2770_v8  ;;  %v1505_v32 = vld [vmem:[#allocation10 + $0x20] sm:$0xff]  ;;  %v1504_v47 = vld [vmem:[#allocation10 + $0x18] sm:$0xff] }
 0x199   : > { %2044 = vmatprep.subr.mxu1 %v1508_v48  ;;  %v1001_v20 = vadd.f32 %v985_v50, %v916_v2  ;;  %v917_v22 = vadd.f32 %v901_v59, %v833_v3  ;;  %v1239_v23 = vmul.f32 %v2780_v16, %v2844_v12  ;;  %v1323_v27 = vmul.f32 %v2784_v21, %v2850_v24 }
 0x19a   : > { %2045 = vmatpush3.msra.mxu1 %v1508_v48  ;;  %v1084_v19 = vadd.f32 %v1068_v35, %v1000_v1  ;;  %v2858_v28 = vmul.f32 %v2787_v25, %v2852_v26  ;;  %v750_v30 = vadd.f32 %v2766_v5, %v734_v13  ;;  %v902_v31 = vmul.f32 %v1117_v52, %v2772_v9  ;;  %v2873_v52 = vld [vmem:[#allocation2 + $0x6f] sm:$0xff] }
 0x19b   : > { %2046 = vmatprep.subr.mxu1 %v1507_v0  ;;  %v1085_v34 = vadd.f32 %v1069_v51, %v1001_v20  ;;  %v1002_v35 = vadd.f32 %v986_v4, %v917_v22  ;;  %v987_v40 = vmul.f32 %v2819_v37, %v2774_v10  ;;  %v1071_v44 = vmul.f32 %v2821_v56, %v2776_v14  ;;  %v2885_v1 = vld [vmem:[#allocation2 + $0x71] sm:$0xff] }
 0x19c   : > { %2047 = vmatpush3.msra.mxu1 %v1507_v0  ;;  %v1168_v33 = vadd.f32 %v1152_v36, %v1084_v19  ;;  %v834_v41 = vadd.f32 %v818_v17, %v750_v30  ;;  %v735_v45 = vmul.f32 %v2791_v29, %v2768_v7  ;;  %v819_v46 = vmul.f32 %v2801_v39, %v2770_v8  ;;  %v2877_v29 = vld [vmem:[#allocation2 + $0x70] sm:$0xff] }
 0x19d   : > { %2048 = vmatprep.subr.mxu1 %v1506_v18  ;;  %v1169_v48 = vadd.f32 %v1153_v60, %v1085_v34  ;;  %v1086_v50 = vadd.f32 %v1070_v6, %v1002_v35  ;;  %v1155_v51 = vmul.f32 %v2823_v57, %v2778_v15  ;;  %v1240_v54 = vmul.f32 %v2780_v16, %v2873_v52  ;;  %v1502_v6 = vld [vmem:[#allocation10 + $0x8] sm:$0xff]  ;;  %v1501_v22 = vld [vmem:[#allocation10] sm:$0xff] }
 0x19e   : > { %2049 = vmatpush3.msra.mxu1 %v1506_v18  ;;  %v1253_v36 = vadd.f32 %v2799_v38, %v1168_v33  ;;  %v918_v53 = vadd.f32 %v902_v31, %v834_v41  ;;  %v751_v39 = vadd.f32 %v2766_v5, %v735_v45  ;;  %v903_v55 = vmul.f32 %v2808_v43, %v2772_v9  ;;  %v1503_v38 = vld [vmem:[#allocation10 + $0x10] sm:$0xff]  ;;  %v2902_v33 = vld [vmem:[#allocation2 + $0x87] sm:$0xff] }
 0x19f   : > { %2050 = vmatprep.subr.mxu1 %v1505_v32  ;;  %v1254_v59 = vadd.f32 %v1238_v61, %v1169_v48  ;;  %v1170_v60 = vadd.f32 %v1154_v11, %v1086_v50  ;;  %v1324_v0 = vmul.f32 %v2784_v21, %v2877_v29  ;;  %v1408_v3 = vmul.f32 %v2787_v25, %v2885_v1 }
 0x1a0   : > { %2051 = vmatpush3.msra.mxu1 %v1505_v32  ;;  %v1337_v58 = vadd.f32 %v2806_v42, %v1253_v36  ;;  %v1003_v2 = vadd.f32 %v987_v40, %v918_v53  ;;  %v835_v4 = vadd.f32 %v819_v46, %v751_v39  ;;  %v988_v43 = vmul.f32 %v2844_v12, %v2774_v10 }
 0x1a1   : > { %2052 = vmatprep.subr.mxu1 %v1504_v47  ;;  %v1338_v61 = vadd.f32 %v2832_v62, %v1254_v59  ;;  %v1255_v11 = vadd.f32 %v1239_v23, %v1170_v60  ;;  %v1072_v13 = vmul.f32 %v2850_v24, %v2776_v14  ;;  %v736_v19 = vmul.f32 %v2819_v37, %v2768_v7 }
 0x1a2   : > { %2053 = vmatpush3.msra.mxu1 %v1504_v47  ;;  %v1421_v42 = vadd.f32 %v2814_v49, %v1337_v58  ;;  %v1087_v17 = vadd.f32 %v1071_v44, %v1003_v2  ;;  %v919_v18 = vadd.f32 %v903_v55, %v835_v4  ;;  %v820_v20 = vmul.f32 %v2821_v56, %v2770_v8  ;;  %v1289_v44 = vld [vmem:[#allocation2 + $0x88] sm:$0xff] }
 0x1a3   : > { %2054 = vmatprep.subr.mxu1 %v1503_v38  ;;  %v1422_v49 = vadd.f32 %v2836_v63, %v1338_v61  ;;  %v1339_v31 = vadd.f32 %v1323_v27, %v1255_v11  ;;  %v1156_v62 = vmul.f32 %v2852_v26, %v2778_v15  ;;  %v752_v34 = vadd.f32 %v2766_v5, %v736_v19  ;;  %v1206_v2 = vld [vmem:[#allocation2 + $0x8f] sm:$0xff] }
 0x1a4   : > { %2055 = vmatpush3.msra.mxu1 %v1503_v38  ;;  %v1469_v30 = vmax.f32 %v1421_v42, 0.0  ;;  %v1171_v23 = vadd.f32 %v1155_v51, %v1087_v17  ;;  %v1004_v32 = vadd.f32 %v988_v43, %v919_v18  ;;  %v904_v37 = vmul.f32 %v2823_v57, %v2772_v9  ;;  %v1290_v43 = vld [vmem:[#allocation2 + $0x90] sm:$0xff] }
 0x1a5   : > { %2056 = vmatprep.subr.mxu1 %v1502_v6  ;;  %v1470_v35 = vmax.f32 %v1422_v49, 0.0  ;;  %v1423_v40 = vadd.f32 %v2858_v28, %v1339_v31  ;;  %v1241_v63 = vmul.f32 %v2780_v16, %v2902_v33  ;;  %v836_v45 = vadd.f32 %v820_v20, %v752_v34  ;;  %v1373_v28 = vld [vmem:[#allocation2 + $0x89] sm:$0xff] }
 0x1a6   : > { %2057 = vmatpush3.msra.mxu1 %v1502_v6  ;;  %v1485_v56 = vmin.f32 %v1469_v30, 6.0  ;;  %v1256_v27 = vadd.f32 %v1240_v54, %v1171_v23  ;;  %v1088_v41 = vadd.f32 %v1072_v13, %v1004_v32  ;;  %v989_v46 = vmul.f32 %v2873_v52, %v2774_v10 }
 0x1a7   : > { %2058 = vmatprep.subr.mxu1 %v1501_v22  ;;  %v1486_v47 = vmin.f32 %v1470_v35, 6.0  ;;  %v1471_v57 = vmax.f32 %v1423_v40, 0.0  ;;  %v1325_v36 = vmul.f32 %v2784_v21, %v1289_v44  ;;  %v920_v51 = vadd.f32 %v904_v37, %v836_v45 }
 0x1a8   : > { %2059 = vmatpush3.msra.mxu1 %v1501_v22  ;;  %2060 = vmatprep.mubr.f32.mxu1 %v1485_v56  ;;  %v1340_v48 = vadd.f32 %v1324_v0, %v1256_v27  ;;  %v1172_v50 = vadd.f32 %v1156_v62, %v1088_v41  ;;  %v1073_v53 = vmul.f32 %v2877_v29, %v2776_v14  ;;  %v1207_v62 = vld [vmem:[#allocation2 + $0xa7] sm:$0xff] }
 0x1a9   : > { %2061 = vmatmul.mubr.f32.vlgmr.msra.gmra.mxu1 %v1486_v47  ;;  %v1487_v54 = vmin.f32 %v1471_v57, 6.0  ;;  %v1409_v39 = vmul.f32 %v2787_v25, %v1373_v28  ;;  %v737_v55 = vmul.f32 %v2844_v12, %v2768_v7  ;;  %v821_v38 = vmul.f32 %v2850_v24, %v2770_v8  ;;  %v1291_v56 = vld [vmem:[#allocation2 + $0xa8] sm:$0xff] }
 0x1aa   : > { %v1424_v58 = vadd.f32 %v1408_v3, %v1340_v48  ;;  %v1257_v59 = vadd.f32 %v1241_v63, %v1172_v50  ;;  %v1005_v60 = vadd.f32 %v989_v46, %v920_v51  ;;  %v1157_v0 = vmul.f32 %v2885_v1, %v2778_v15  ;;  %v1374_v3 = vld [vmem:[#allocation2 + $0x91] sm:$0xff]  ;;  %v1375_v46 = vld [vmem:[#allocation2 + $0xa9] sm:$0xff] }
 0x1ab   : > { %2063 = vmatprep.mubr.f32.mxu1 %v1487_v54  ;;  %v1242_v4 = vmul.f32 %v2780_v16, %v1206_v2  ;;  %v753_v6 = vadd.f32 %v2766_v5, %v737_v55  ;;  %v905_v42 = vmul.f32 %v2852_v26, %v2772_v9  ;;  %v1326_v24 = vmul.f32 %v2784_v21, %v1290_v43  ;;  %v1208_v54 = vld [vmem:[#allocation2 + $0xaf] sm:$0xff] }
 0x1ac   : > { %v1472_v12 = vmax.f32 %v1424_v58, 0.0  ;;  %v1341_v61 = vadd.f32 %v1325_v36, %v1257_v59  ;;  %v1089_v11 = vadd.f32 %v1073_v53, %v1005_v60  ;;  %v990_v17 = vmul.f32 %v2902_v33, %v2774_v10 }
 0x1ad   : > { %v837_v13 = vadd.f32 %v821_v38, %v753_v6  ;;  %v738_v18 = vmul.f32 %v2873_v52, %v2768_v7  ;;  %v822_v19 = vmul.f32 %v2877_v29, %v2770_v8  ;;  %v1410_v26 = vmul.f32 %v2787_v25, %v1374_v3 }
 0x1ae   : > { %v1488_v20 = vmin.f32 %v1472_v12, 6.0  ;;  %v1425_v22 = vadd.f32 %v1409_v39, %v1341_v61  ;;  %v1173_v30 = vadd.f32 %v1157_v0, %v1089_v11  ;;  %v1074_v31 = vmul.f32 %v1289_v44, %v2776_v14  ;;  %v1292_v39 = vld [vmem:[#allocation2 + $0xb0] sm:$0xff] }
 0x1af   : > { %v921_v49 = vadd.f32 %v905_v42, %v837_v13  ;;  %v754_v23 = vadd.f32 %v2766_v5, %v738_v18  ;;  %v906_v32 = vmul.f32 %v2885_v1, %v2772_v9  ;;  %v1158_v37 = vmul.f32 %v1373_v28, %v2778_v15 }
 0x1b0   : > { %2064 = vmatmul.mubr.f32.gmra.mxu1 %v1488_v20  ;;  %v1473_v34 = vmax.f32 %v1425_v22, 0.0  ;;  %v1258_v52 = vadd.f32 %v1242_v4, %v1173_v30  ;;  %v1243_v29 = vmul.f32 %v2780_v16, %v1207_v62  ;;  %v1327_v40 = vmul.f32 %v2784_v21, %v1291_v56 }
 0x1b1   : > { %v1006_v35 = vadd.f32 %v990_v17, %v921_v49  ;;  %v838_v63 = vadd.f32 %v822_v19, %v754_v23  ;;  %v991_v27 = vmul.f32 %v1206_v2, %v2774_v10  ;;  %v739_v1 = vmul.f32 %v2902_v33, %v2768_v7 }
 0x1b2   : > { %v1489_v41 = vmin.f32 %v1473_v34, 6.0  ;;  %v1342_v45 = vadd.f32 %v1326_v24, %v1258_v52  ;;  %v823_v47 = vmul.f32 %v1289_v44, %v2770_v8  ;;  %v1411_v36 = vmul.f32 %v2787_v25, %v1375_v46 }
 0x1b3   : > { %v1090_v57 = vadd.f32 %v1074_v31, %v1006_v35  ;;  %v922_v48 = vadd.f32 %v906_v32, %v838_v63  ;;  %v1075_v50 = vmul.f32 %v1290_v43, %v2776_v14  ;;  %v1159_v53 = vmul.f32 %v1374_v3, %v2778_v15  ;;  %v1293_v31 = vld [vmem:[#allocation2 + $0xc8] sm:$0xff] }
 0x1b4   : > { %2066 = vmatprep.mubr.f32.mxu1 %v1489_v41  ;;  %v1426_v51 = vadd.f32 %v1410_v26, %v1342_v45  ;;  %v755_v55 = vadd.f32 %v2766_v5, %v739_v1  ;;  %v907_v38 = vmul.f32 %v1373_v28, %v2772_v9  ;;  %v1244_v44 = vmul.f32 %v2780_v16, %v1208_v54  ;;  %v1376_v28 = vld [vmem:[#allocation2 + $0xb1] sm:$0xff]  ;;  %v1377_v41 = vld [vmem:[#allocation2 + $0xc9] sm:$0xff] }
 0x1b5   : > { %v1174_v58 = vadd.f32 %v1158_v37, %v1090_v57  ;;  %v1007_v33 = vadd.f32 %v991_v27, %v922_v48  ;;  %v1328_v59 = vmul.f32 %v2784_v21, %v1292_v39  ;;  %v992_v4 = vmul.f32 %v1207_v62, %v2774_v10 }
 0x1b6   : > { %v1474_v60 = vmax.f32 %v1426_v51, 0.0  ;;  %v839_v0 = vadd.f32 %v823_v47, %v755_v55  ;;  %v740_v6 = vmul.f32 %v1206_v2, %v2768_v7  ;;  %v1076_v61 = vmul.f32 %v1291_v56, %v2776_v14  ;;  %v1209_v2 = vld [vmem:[#allocation2 + $0xc7] sm:$0xff]  ;;  %v1210_v51 = vld [vmem:[#allocation2 + $0xcf] sm:$0xff] }
 0x1b7   : > { %v1259_v42 = vadd.f32 %v1243_v29, %v1174_v58  ;;  %v1091_v12 = vadd.f32 %v1075_v50, %v1007_v33  ;;  %v824_v11 = vmul.f32 %v1290_v43, %v2770_v8  ;;  %v908_v18 = vmul.f32 %v1374_v3, %v2772_v9 }
 0x1b8   : > { %v1490_v24 = vmin.f32 %v1474_v60, 6.0  ;;  %v923_v13 = vadd.f32 %v907_v38, %v839_v0  ;;  %v756_v17 = vadd.f32 %v2766_v5, %v740_v6  ;;  %v1412_v22 = vmul.f32 %v2787_v25, %v1376_v28 }
 0x1b9   : > { %v1343_v19 = vadd.f32 %v1327_v40, %v1259_v42  ;;  %v1175_v20 = vadd.f32 %v1159_v53, %v1091_v12  ;;  %v1160_v30 = vmul.f32 %v1375_v46, %v2778_v15  ;;  %v1245_v49 = vmul.f32 %v2780_v16, %v1209_v2 }
 0x1ba   : > { %2067 = vmatmul.mubr.f32.gmra.mxu1 %v1490_v24  ;;  %v1008_v26 = vadd.f32 %v992_v4, %v923_v13  ;;  %v840_v43 = vadd.f32 %v824_v11, %v756_v17  ;;  %v993_v23 = vmul.f32 %v1208_v54, %v2774_v10  ;;  %v1329_v52 = vmul.f32 %v2784_v21, %v1293_v31  ;;  %v1378_v11 = vld [vmem:[#allocation2 + $0xd1] sm:$0xff] }
 0x1bb   : > { %v1427_v32 = vadd.f32 %v1411_v36, %v1343_v19  ;;  %v1260_v34 = vadd.f32 %v1244_v44, %v1175_v20  ;;  %v741_v3 = vmul.f32 %v1207_v62, %v2768_v7  ;;  %v1077_v35 = vmul.f32 %v1292_v39, %v2776_v14  ;;  %v1294_v44 = vld [vmem:[#allocation2 + $0xd0] sm:$0xff] }
 0x1bc   : > { %v1092_v37 = vadd.f32 %v1076_v61, %v1008_v26  ;;  %v924_v29 = vadd.f32 %v908_v18, %v840_v43  ;;  %v825_v40 = vmul.f32 %v1291_v56, %v2770_v8  ;;  %v909_v1 = vmul.f32 %v1375_v46, %v2772_v9 }
 0x1bd   : > { %v1475_v63 = vmax.f32 %v1427_v32, 0.0  ;;  %v1344_v27 = vadd.f32 %v1328_v59, %v1260_v34  ;;  %v757_v45 = vadd.f32 %v2766_v5, %v741_v3  ;;  %v1413_v57 = vmul.f32 %v2787_v25, %v1377_v41 }
 0x1be   : > { %v1176_v47 = vadd.f32 %v1160_v30, %v1092_v37  ;;  %v1009_v36 = vadd.f32 %v993_v23, %v924_v29  ;;  %v1161_v48 = vmul.f32 %v1376_v28, %v2778_v15  ;;  %v994_v55 = vmul.f32 %v1209_v2, %v2774_v10  ;;  %v1295_v23 = vld [vmem:[#allocation2 + $0xe8] sm:$0xff] }
 0x1bf   : > { %v1491_v62 = vmin.f32 %v1475_v63, 6.0  ;;  %v1428_v50 = vadd.f32 %v1412_v22, %v1344_v27  ;;  %v841_v53 = vadd.f32 %v825_v40, %v757_v45  ;;  %v1246_v58 = vmul.f32 %v2780_v16, %v1210_v51  ;;  %v1379_v40 = vld [vmem:[#allocation2 + $0xe9] sm:$0xff] }
 0x1c0   : > { %v1261_v56 = vadd.f32 %v1245_v49, %v1176_v47  ;;  %v1093_v38 = vadd.f32 %v1077_v35, %v1009_v36  ;;  %v1078_v33 = vmul.f32 %v1293_v31, %v2776_v14  ;;  %v742_v60 = vmul.f32 %v1208_v54, %v2768_v7  ;;  %v1211_v54 = vld [vmem:[#allocation2 + $0xe7] sm:$0xff] }
 0x1c1   : > { %2069 = vmatprep.mubr.f32.mxu1 %v1491_v62  ;;  %v1476_v46 = vmax.f32 %v1428_v50, 0.0  ;;  %v925_v59 = vadd.f32 %v909_v1, %v841_v53  ;;  %v826_v0 = vmul.f32 %v1292_v39, %v2770_v8  ;;  %v1330_v42 = vmul.f32 %v2784_v21, %v1294_v44 }
 0x1c2   : > { %v1345_v4 = vadd.f32 %v1329_v52, %v1261_v56  ;;  %v1177_v6 = vadd.f32 %v1161_v48, %v1093_v38  ;;  %v1162_v12 = vmul.f32 %v1377_v41, %v2778_v15  ;;  %v758_v13 = vadd.f32 %v2766_v5, %v742_v60 }
 0x1c3   : > { %v1492_v61 = vmin.f32 %v1476_v46, 6.0  ;;  %v1010_v24 = vadd.f32 %v994_v55, %v925_v59  ;;  %v910_v17 = vmul.f32 %v1376_v28, %v2772_v9  ;;  %v1414_v20 = vmul.f32 %v2787_v25, %v1378_v11  ;;  %v1296_v55 = vld [vmem:[#allocation2 + $0xf0] sm:$0xff] }
 0x1c4   : > { %v1429_v18 = vadd.f32 %v1413_v57, %v1345_v4  ;;  %v1262_v19 = vadd.f32 %v1246_v58, %v1177_v6  ;;  %v1247_v22 = vmul.f32 %v2780_v16, %v1211_v54  ;;  %v842_v30 = vadd.f32 %v826_v0, %v758_v13  ;;  %v1380_v0 = vld [vmem:[#allocation2 + $0xf1] sm:$0xff]  ;;  %v1213_v4 = vld [vmem:[#allocation2 + $0x107] sm:$0xff] }
 0x1c5   : > { %2070 = vmatmul.mubr.f32.gmra.mxu1 %v1492_v61  ;;  %v1094_v39 = vadd.f32 %v1078_v33, %v1010_v24  ;;  %v995_v26 = vmul.f32 %v1210_v51, %v2774_v10  ;;  %v743_v32 = vmul.f32 %v1209_v2, %v2768_v7  ;;  %v827_v34 = vmul.f32 %v1293_v31, %v2770_v8  ;;  %v1212_v31 = vld [vmem:[#allocation2 + $0xef] sm:$0xff] }
 0x1c6   : > { %v1477_v49 = vmax.f32 %v1429_v18, 0.0  ;;  %v1346_v43 = vadd.f32 %v1330_v42, %v1262_v19  ;;  %v1331_v52 = vmul.f32 %v2784_v21, %v1295_v23  ;;  %v926_v3 = vadd.f32 %v910_v17, %v842_v30  ;;  %v1297_v17 = vld [vmem:[#allocation2 + $0x108] sm:$0xff] }
 0x1c7   : > { %v1178_v28 = vadd.f32 %v1162_v12, %v1094_v39  ;;  %v1079_v37 = vmul.f32 %v1294_v44, %v2776_v14  ;;  %v759_v63 = vadd.f32 %v2766_v5, %v743_v32  ;;  %v911_v27 = vmul.f32 %v1377_v41, %v2772_v9 }
 0x1c8   : > { %v1493_v29 = vmin.f32 %v1477_v49, 6.0  ;;  %v1430_v35 = vadd.f32 %v1414_v20, %v1346_v43  ;;  %v1415_v1 = vmul.f32 %v2787_v25, %v1379_v40  ;;  %v1011_v47 = vadd.f32 %v995_v26, %v926_v3  ;;  %v1381_v49 = vld [vmem:[#allocation2 + $0x109] sm:$0xff] }
 0x1c9   : > { %v1263_v45 = vadd.f32 %v1247_v22, %v1178_v28  ;;  %v1163_v2 = vmul.f32 %v1378_v11, %v2778_v15  ;;  %v1248_v36 = vmul.f32 %v2780_v16, %v1212_v31  ;;  %v843_v48 = vadd.f32 %v827_v34, %v759_v63 }
 0x1ca   : > { %2072 = vmatprep.mubr.f32.mxu1 %v1493_v29  ;;  %v1478_v57 = vmax.f32 %v1430_v35, 0.0  ;;  %v996_v62 = vmul.f32 %v1211_v54, %v2774_v10  ;;  %v1095_v53 = vadd.f32 %v1079_v37, %v1011_v47  ;;  %v744_v56 = vmul.f32 %v1210_v51, %v2768_v7 }
 0x1cb   : > { %v1347_v50 = vadd.f32 %v1331_v52, %v1263_v45  ;;  %v828_v41 = vmul.f32 %v1294_v44, %v2770_v8  ;;  %v1332_v58 = vmul.f32 %v2784_v21, %v1296_v55  ;;  %v927_v33 = vadd.f32 %v911_v27, %v843_v48  ;;  %v1214_v52 = vld [vmem:[#allocation2 + $0x10f] sm:$0xff] }
 0x1cc   : > { %v1494_v38 = vmin.f32 %v1478_v57, 6.0  ;;  %v1080_v46 = vmul.f32 %v1295_v23, %v2776_v14  ;;  %v1179_v60 = vadd.f32 %v1163_v2, %v1095_v53  ;;  %v760_v6 = vadd.f32 %v2766_v5, %v744_v56  ;;  %v1298_v48 = vld [vmem:[#allocation2 + $0x110] sm:$0xff] }
 0x1cd   : > { %v1431_v59 = vadd.f32 %v1415_v1, %v1347_v50  ;;  %v912_v42 = vmul.f32 %v1378_v11, %v2772_v9  ;;  %v1416_v12 = vmul.f32 %v2787_v25, %v1380_v0  ;;  %v1012_v51 = vadd.f32 %v996_v62, %v927_v33  ;;  %v1215_v50 = vld [vmem:[#allocation2 + $0x127] sm:$0xff]  ;;  %v1382_v33 = vld [vmem:[#allocation2 + $0x111] sm:$0xff] }
 0x1ce   : > { %2073 = vmatmul.mubr.f32.gmra.mxu1 %v1494_v38  ;;  %v1164_v44 = vmul.f32 %v1379_v40, %v2778_v15  ;;  %v1249_v61 = vmul.f32 %v2780_v16, %v1213_v4  ;;  %v1264_v13 = vadd.f32 %v1248_v36, %v1179_v60  ;;  %v844_v18 = vadd.f32 %v828_v41, %v760_v6 }
 0x1cf   : > { %v1479_v24 = vmax.f32 %v1431_v59, 0.0  ;;  %v997_v19 = vmul.f32 %v1212_v31, %v2774_v10  ;;  %v1096_v20 = vadd.f32 %v1080_v46, %v1012_v51  ;;  %v1333_v39 = vmul.f32 %v2784_v21, %v1297_v17  ;;  %v1299_v59 = vld [vmem:[#allocation2 + $0x128] sm:$0xff] }
 0x1d0   : > { %v745_v22 = vmul.f32 %v1211_v54, %v2768_v7  ;;  %v829_v11 = vmul.f32 %v1295_v23, %v2770_v8  ;;  %v1348_v26 = vadd.f32 %v1332_v58, %v1264_v13  ;;  %v928_v43 = vadd.f32 %v912_v42, %v844_v18 }
 0x1d1   : > { %v1495_v30 = vmin.f32 %v1479_v24, 6.0  ;;  %v1081_v32 = vmul.f32 %v1296_v55, %v2776_v14  ;;  %v1180_v34 = vadd.f32 %v1164_v44, %v1096_v20  ;;  %v1417_v28 = vmul.f32 %v2787_v25, %v1381_v49  ;;  %v1383_v44 = vld [vmem:[#allocation2 + $0x129] sm:$0xff] }
 0x1d2   : > { %v761_v3 = vadd.f32 %v2766_v5, %v745_v22  ;;  %v913_v37 = vmul.f32 %v1379_v40, %v2772_v9  ;;  %v1432_v29 = vadd.f32 %v1416_v12, %v1348_v26  ;;  %v1013_v35 = vadd.f32 %v997_v19, %v928_v43  ;;  %v1300_v19 = vld [vmem:[#allocation2 + $0x130] sm:$0xff] }
 0x1d3   : > { %2075 = vmatprep.mubr.f32.mxu1 %v1495_v30  ;;  %v1165_v54 = vmul.f32 %v1380_v0, %v2778_v15  ;;  %v1250_v23 = vmul.f32 %v2780_v16, %v1214_v52  ;;  %v1265_v63 = vadd.f32 %v1249_v61, %v1180_v34  ;;  %v998_v45 = vmul.f32 %v1213_v4, %v2774_v10  ;;  %v1216_v61 = vld [vmem:[#allocation2 + $0x12f] sm:$0xff] }
 0x1d4   : > { %v845_v27 = vadd.f32 %v829_v11, %v761_v3  ;;  %v746_v1 = vmul.f32 %v1212_v31, %v2768_v7  ;;  %v1480_v47 = vmax.f32 %v1432_v29, 0.0  ;;  %v1097_v2 = vadd.f32 %v1081_v32, %v1013_v35  ;;  %v1384_v30 = vld [vmem:[#allocation2 + $0x131] sm:$0xff] }
 0x1d5   : > { %v1082_v57 = vmul.f32 %v1297_v17, %v2776_v14  ;;  %v830_v36 = vmul.f32 %v1296_v55, %v2770_v8  ;;  %v1349_v40 = vadd.f32 %v1333_v39, %v1265_v63  ;;  %v914_v56 = vmul.f32 %v1380_v0, %v2772_v9 }
 0x1d6   : > { %v929_v62 = vadd.f32 %v913_v37, %v845_v27  ;;  %v762_v53 = vadd.f32 %v2766_v5, %v746_v1  ;;  %v1496_v41 = vmin.f32 %v1480_v47, 6.0  ;;  %v1181_v38 = vadd.f32 %v1165_v54, %v1097_v2  ;;  %v1874_v27 = vld [vmem:[%s2694_s23 + $0x10] sm:$0xff] }
 0x1d7   : > { %v1334_v58 = vmul.f32 %v2784_v21, %v1298_v48  ;;  %v1166_v7 = vmul.f32 %v1381_v49, %v2778_v15  ;;  %v1433_v31 = vadd.f32 %v1417_v28, %v1349_v40  ;;  %v999_v8 = vmul.f32 %v1214_v52, %v2774_v10 }
 0x1d8   : > { %v1014_v46 = vadd.f32 %v998_v45, %v929_v62  ;;  %v846_v60 = vadd.f32 %v830_v36, %v762_v53  ;;  %2076 = vmatmul.mubr.f32.gmra.mxu1 %v1496_v41  ;;  %v1266_v55 = vadd.f32 %v1250_v23, %v1181_v38  ;;  %v1418_v4 = vmul.f32 %v2787_v25, %v1382_v33  ;;  %v1879_v41 = vld [vmem:[%s2694_s23 + $0x38] sm:$0xff] }
 0x1d9   : > { %v1251_v5 = vmul.f32 %v2780_v16, %v1215_v50  ;;  %v1481_v9 = vmax.f32 %v1433_v31, 0.0  ;;  %v1083_v42 = vmul.f32 %v1298_v48, %v2776_v14  ;;  %v1335_v51 = vmul.f32 %v2784_v21, %v1299_v59  ;;  %v1876_v48 = vld [vmem:[%s2694_s23 + $0x20] sm:$0xff] }
 0x1da   : > { %v1098_v0 = vadd.f32 %v1082_v57, %v1014_v46  ;;  %v930_v6 = vadd.f32 %v914_v56, %v846_v60  ;;  %v1350_v12 = vadd.f32 %v1334_v58, %v1266_v55  ;;  %v1167_v10 = vmul.f32 %v1382_v33, %v2778_v15  ;;  %v1877_v57 = vld [vmem:[%s2694_s23 + $0x28] sm:$0xff] }
 0x1db   : > { %v1497_v24 = vmin.f32 %v1481_v9, 6.0  ;;  %v1419_v39 = vmul.f32 %v2787_v25, %v1383_v44  ;;  %v1252_v11 = vmul.f32 %v2780_v16, %v1216_v61  ;;  %v1336_v43 = vmul.f32 %v2784_v21, %v1300_v19  ;;  %v3032_v21 = vld [vmem:[%s3198_s27] ss:$0 sm:$0xff]  ;;  %v1881_v60 = vld [vmem:[%s2694_s23 + $0x48] sm:$0xff]  ;;  %v1882_v44 = vld [vmem:[%s2694_s23 + $0x50] sm:$0xff] }
 0x1dc   : > { %v1182_v13 = vadd.f32 %v1166_v7, %v1098_v0  ;;  %v1015_v17 = vadd.f32 %v999_v8, %v930_v6  ;;  %v1434_v18 = vadd.f32 %v1418_v4, %v1350_v12  ;;  %v1420_v15 = vmul.f32 %v2787_v25, %v1384_v30  ;;  %v1875_v25 = vld [vmem:[%s2694_s23 + $0x18] sm:$0xff]  ;;  %v1878_v7 = vld [vmem:[%s2694_s23 + $0x30] sm:$0xff]  ;;  %v1880_v4 = vld [vmem:[%s2694_s23 + $0x40] sm:$0xff] }
 0x1dd   : > { %2078 = vmatprep.mubr.f32.mxu1 %v1497_v24  ;;  %v1887_v30 = vld [vmem:[%s2694_s23 + $0x78] sm:$0xff] }
 0x1de   : > { %v1267_v20 = vadd.f32 %v1251_v5, %v1182_v13  ;;  %v1099_v22 = vadd.f32 %v1083_v42, %v1015_v17  ;;  %v1482_v14 = vmax.f32 %v1434_v18, 0.0  ;;  %v1883_v42 = vld [vmem:[%s2694_s23 + $0x58] sm:$0xff] }
 0x1e0   : > { %v1351_v26 = vadd.f32 %v1335_v51, %v1267_v20  ;;  %v1183_v49 = vadd.f32 %v1167_v10, %v1099_v22  ;;  %v1498_v32 = vmin.f32 %v1482_v14, 6.0  ;;  %v1885_v10 = vld [vmem:[%s2694_s23 + $0x68] sm:$0xff]  ;;  %v1884_v20 = vld [vmem:[%s2694_s23 + $0x60] sm:$0xff] }
 0x1e2   : > { %v1435_v34 = vadd.f32 %v1419_v39, %v1351_v26  ;;  %v1268_v28 = vadd.f32 %v1252_v11, %v1183_v49  ;;  %2079 = vmatmul.mubr.f32.gmra.mxu1 %v1498_v32 }
 0x1e4   : > { %v1483_v52 = vmax.f32 %v1435_v34, 0.0  ;;  %v1352_v3 = vadd.f32 %v1336_v43, %v1268_v28  ;;  %v1886_v43 = vld [vmem:[%s2694_s23 + $0x70] sm:$0xff] }
 0x1e6   : > { %v1499_v37 = vmin.f32 %v1483_v52, 6.0  ;;  %v1436_v16 = vadd.f32 %v1420_v15, %v1352_v3  ;;  %v1889_v52 = vld [vmem:[%s2694_s23 + $0x88] sm:$0xff] }
 0x1e8   : > { %2081 = vmatprep.mubr.f32.mxu1 %v1499_v37  ;;  %v1484_v29 = vmax.f32 %v1436_v16, 0.0  ;;  %v1888_v16 = vld [vmem:[%s2694_s23 + $0x80] sm:$0xff]  ;;  %s2335_s23 = scalar_lea.vmem %s3088_s11, 2048 }
 0x1e9   : > { %p2336_p11 = scmp.ne.s32.totalorder %s3088_s11, %s2335_s23  ;;  %p2343_p3 = scmp.lt.s32.totalorder %s2341_s12, %s2335_s23 }
 0x1ea   : > { %v1500_v35 = vmin.f32 %v1484_v29, 6.0 }
 0x1eb   : > { %p2337_p12 = pnand %p2336_p11, %p2589_p6  ;;  %p2344_p5 = por %p2343_p3, %p2342_p2 }
 0x1ec   : > { %2082 = vmatmul.mubr.f32.gmra.mxu1 %v1500_v35 }
 0x1ed   : > { %p2338_p0 = pneg %p2337_p12 }
 0x1ef   : > { %p2345_p13 = pnand %p2344_p5, %p2338_p0 }
 0x269   : > { %v2062_v54 = vpop.f32.mrf.mxu1 }
 0x26a   : > { %v1596_v23 = vadd.f32 %v2062_v54, %v3032_v21 }
 0x26b   : > { %v1590_v63 = vpop.f32.mrf.mxu1 }
 0x26c   : > { %v1687_v45 = vadd.f32 %v1875_v25, %v1596_v23  ;;  %v1591_v1 = vadd.f32 %v3032_v21, %v1590_v63 }
 0x26e   : > { %1703 = vst [vmem:[%s2759_s21 + $0x8] sm:$0xff] %v1687_v45  ;;  %v1686_v47 = vadd.f32 %v1874_v27, %v1591_v1 }
 0x270   : > { %1702 = vst [vmem:[%s2759_s21] sm:$0xff] %v1686_v47  ;;  %v2065_v2 = vpop.f32.mrf.mxu1 }
 0x271   : > { %v1606_v36 = vadd.f32 %v2065_v2, %v3032_v21 }
 0x272   : > { %v1600_v40 = vpop.f32.mrf.mxu1 }
 0x273   : > { %v1689_v62 = vadd.f32 %v1877_v57, %v1606_v36  ;;  %v1601_v50 = vadd.f32 %v3032_v21, %v1600_v40 }
 0x275   : > { %1705 = vst [vmem:[%s2759_s21 + $0x18] sm:$0xff] %v1689_v62  ;;  %v1688_v53 = vadd.f32 %v1876_v48, %v1601_v50 }
 0x277   : > { %1704 = vst [vmem:[%s2759_s21 + $0x10] sm:$0xff] %v1688_v53 }
 0x27a   : > { %v2068_v56 = vpop.f32.mrf.mxu1 }
 0x27b   : > { %v1616_v38 = vadd.f32 %v2068_v56, %v3032_v21 }
 0x27c   : > { %v1610_v58 = vpop.f32.mrf.mxu1 }
 0x27d   : > { %v1691_v31 = vadd.f32 %v1879_v41, %v1616_v38  ;;  %v1611_v33 = vadd.f32 %v3032_v21, %v1610_v58 }
 0x27f   : > { %1707 = vst [vmem:[%s2759_s21 + $0x28] sm:$0xff] %v1691_v31  ;;  %v1690_v46 = vadd.f32 %v1878_v7, %v1611_v33 }
 0x281   : > { %1706 = vst [vmem:[%s2759_s21 + $0x20] sm:$0xff] %v1690_v46 }
 0x285   : > { %v2071_v59 = vpop.f32.mrf.mxu1 }
 0x286   : > { %v1626_v8 = vadd.f32 %v2071_v59, %v3032_v21 }
 0x287   : > { %v1620_v55 = vpop.f32.mrf.mxu1 }
 0x288   : > { %v1693_v5 = vadd.f32 %v1881_v60, %v1626_v8  ;;  %v1621_v9 = vadd.f32 %v3032_v21, %v1620_v55 }
 0x28a   : > { %1709 = vst [vmem:[%s2759_s21 + $0x38] sm:$0xff] %v1693_v5  ;;  %v1692_v0 = vadd.f32 %v1880_v4, %v1621_v9 }
 0x28c   : > { %1708 = vst [vmem:[%s2759_s21 + $0x30] sm:$0xff] %v1692_v0 }
 0x28e   : > { %v2074_v6 = vpop.f32.mrf.mxu1 }
 0x28f   : > { %v1636_v12 = vadd.f32 %v2074_v6, %v3032_v21 }
 0x290   : > { %v1630_v51 = vpop.f32.mrf.mxu1 }
 0x291   : > { %v1695_v61 = vadd.f32 %v1883_v42, %v1636_v12  ;;  %v1631_v24 = vadd.f32 %v3032_v21, %v1630_v51 }
 0x293   : > { %1711 = vst [vmem:[%s2759_s21 + $0x48] sm:$0xff] %v1695_v61  ;;  %v1694_v13 = vadd.f32 %v1882_v44, %v1631_v24 }
 0x295   : > { %1710 = vst [vmem:[%s2759_s21 + $0x40] sm:$0xff] %v1694_v13 }
 0x298   : > { %v2077_v17 = vpop.f32.mrf.mxu1 }
 0x299   : > { %v1646_v18 = vadd.f32 %v2077_v17, %v3032_v21 }
 0x29a   : > { %v1640_v19 = vpop.f32.mrf.mxu1 }
 0x29b   : > { %v1697_v39 = vadd.f32 %v1885_v10, %v1646_v18  ;;  %v1641_v22 = vadd.f32 %v3032_v21, %v1640_v19 }
 0x29d   : > { %1713 = vst [vmem:[%s2759_s21 + $0x58] sm:$0xff] %v1697_v39  ;;  %v1696_v11 = vadd.f32 %v1884_v20, %v1641_v22 }
 0x29f   : > { %1712 = vst [vmem:[%s2759_s21 + $0x50] sm:$0xff] %v1696_v11 }
 0x2a2   : > { %v2080_v14 = vpop.f32.mrf.mxu1 }
 0x2a3   : > { %v1656_v26 = vadd.f32 %v2080_v14, %v3032_v21 }
 0x2a4   : > { %v1650_v49 = vpop.f32.mrf.mxu1 }
 0x2a5   : > { %v1699_v32 = vadd.f32 %v1887_v30, %v1656_v26  ;;  %v1651_v34 = vadd.f32 %v3032_v21, %v1650_v49 }
 0x2a7   : > { %1715 = vst [vmem:[%s2759_s21 + $0x68] sm:$0xff] %v1699_v32  ;;  %v1698_v28 = vadd.f32 %v1886_v43, %v1651_v34 }
 0x2a9   : > { %1714 = vst [vmem:[%s2759_s21 + $0x60] sm:$0xff] %v1698_v28 }
 0x2ac   : > { %v2083_v15 = vpop.f32.mrf.mxu1 }
 0x2ad   : > { %v1666_v3 = vadd.f32 %v2083_v15, %v3032_v21 }
 0x2ae   : > { %v1660_v37 = vpop.f32.mrf.mxu1 }
 0x2af   : > { %v1701_v29 = vadd.f32 %v1889_v52, %v1666_v3  ;;  %v1661_v35 = vadd.f32 %v3032_v21, %v1660_v37 }
 0x2b1   : > { %1717 = vst [vmem:[%s2759_s21 + $0x78] sm:$0xff] %v1701_v29  ;;  %v1700_v54 = vadd.f32 %v1888_v16, %v1661_v35 }
 0x2b3   : > { %1716 = vst [vmem:[%s2759_s21 + $0x70] sm:$0xff] %v1700_v54 }
 0x2b4   : > { %2348 = shalt.err (!%p2345_p13)
}
 0x2b5   : > { %s2349_s9 = scalar_lea.hbm %s3086_s15, 2048  ;;  %s2353_s27 = scalar_lea.hbm %s3201_s14, 8192 }
 0x2b6   : > { %p2350_p7 = scmp.ne.s32.totalorder %s3086_s15, %s2349_s9  ;;  %p2354_p1 = scmp.lt.s32.totalorder %s3086_s15, %s3201_s14 }
 0x2b7   : > { %p2355_p4 = scmp.lt.s32.totalorder %s2353_s27, %s2349_s9 }
 0x2b8   : > { %p2351_p8 = pnand %p2350_p7, %p2589_p6 }
 0x2b9   : > { %p2356_p11 = por %p2355_p4, %p2354_p1 }
 0x2ba   : > { %p2352_p9 = pneg %p2351_p8 }
 0x2bc   : > { %p2357_p12 = pnand %p2356_p11, %p2352_p9 }
 0x2be   : > { %2360 = shalt.err (!%p2357_p12)
}
 0x2bf   : > { %s2477_s24 = smov 128   ;;  %s2478_s6 = smov 8  }
 0x2c0   : > { %2101 = dma.vmem_to_hbm [thread:$0]  (%p2589_p6), %s3088_s11, 2048, %s3086_s15, %s3094_s18, %s2477_s24, %s2477_s24, %s2478_s6  }
 0x2c1 PF: > { %s3202_s1 = sld [smem:[#allocation20_spill]] }
 0x2c2   : > { %s3203_s30 = sld [smem:[#allocation17_spill]] }
 0x2c7   : > { %p2128_p0 = scmp.ge.s32.totalorder %s3202_s1, 2 }
 0x2c8   : > { %s1750_s23 = sand.u32 1, %s3203_s30  }
 0x2c9   : > { %p2118_p2 = pnand %p2128_p0, %p2595_p10  ;;  %s1751_s19 = scalar_lea.sflag [#allocation6], %s1750_s23 }
 0x2cb   : > { %p2119_p3 = pneg %p2118_p2 }
 0x2cd   : > { %2418 = dma.done.wait (%p2119_p3), %s1751_s19, 2048  }
 0x2ce   : > { %2420 = vsyncadd (%p2119_p3), %s1751_s19, 4294965248  ;;  %s25_s11 = sadd.s32 1, %s3202_s1   ;;  %s3205_s30 = sld [smem:[#allocation19_spill]] }
 0x2cf   : > { %p22_p5 = scmp.ge.s32.totalorder %s25_s11, 6   ;;  %s3206_s15 = sld [smem:[#allocation23_spill]] }
 0x2d0   : > { %s3207_s24 = smov %s2427_s25  ;;  %s3208_s25 = smov %s2431_s26 }
 0x2d1   : > { %s3209_s26 = smov %s2670_s3  ;;  %s3210_s27 = smov %s2439_s28 }
 0x2d2   : > { %s3211_s28 = smov %s2443_s29  ;;  %s3212_s29 = smov %s2673_s5 }
 0x2d3   : > { %s3213_s8 = smov %s2459_s10  ;;  %s3214_s9 = smov %s3217_s16 }
 0x2d4   :  { %24 = sbr.rel (!%p22_p5) target bundleno = 17 (0x11), region = 117 }
 0x2d5   : > { %s3215_s10 = smov %s3206_s15 }
 0x2d9   :  { %1756 = vsyncpa [#allocation5], 1 }
 0x2da   :  { %1758 = vsyncpa [#allocation5 + $0x1], 1 }
 0x2db   :  { %1759 = vsyncpa [#allocation8], 1 }
 0x2dc   :  { %1760 = vsyncpa [#allocation11], 1 }
 0x2dd   :  { %1761 = vsyncpa [#allocation6], 1 }
 0x2de   :  { %1763 = vsyncpa [#allocation6 + $0x1], 1 }

</bundles_post_ra>
